<compile_context>
chip_gen: v7x
topology: tpu7x:2x2x1
jax: 0.10.0
libtpu: 0.0.40
codegen_flags: <defaults>
</compile_context>

<pallas_src>
import math
import jax
import jax.numpy as jnp
from jax import lax
from jax.experimental import pallas as pl
from jax.experimental.pallas import tpu as pltpu

# ---- shrunk BertConfig (from-scratch, synthetic weights) ----
VOCAB = 64
HIDDEN = 32
N_LAYERS = 2
N_HEADS = 2
HEAD_DIM = HIDDEN // N_HEADS
INTERMEDIATE = 64
MAX_POS = 16
TYPE_VOCAB = 2
LN_EPS = 1e-12

BATCH = 2
SEQ = 8


# ---------------- in-kernel helpers ----------------

def _layernorm(x, g, b):
    mu = jnp.mean(x, axis=-1, keepdims=True)
    xc = x - mu
    var = jnp.mean(xc * xc, axis=-1, keepdims=True)
    return xc * lax.rsqrt(var + LN_EPS) * g + b


def _gelu(x):
    # TODO(synk): HF BERT default act is exact erf-GELU; erf has no guaranteed
    # Mosaic lowering, so the tanh-approx GELU ("gelu_new") is used instead.
    c = math.sqrt(2.0 / math.pi)
    return 0.5 * x * (1.0 + jnp.tanh(c * (x + 0.044715 * x * x * x)))


# ---------------- the kernel: one grid step = (batch element, encoder layer) ----------------

def bert_kernel(emb_ref, mask_ref, emb_g_ref, emb_b_ref,
                wq_ref, bq_ref, wk_ref, bk_ref, wv_ref, bv_ref,
                wo_ref, bo_ref, ln1g_ref, ln1b_ref,
                wi_ref, bi_ref, wo2_ref, bo2_ref, ln2g_ref, ln2b_ref,
                pw_ref, pb_ref,
                seq_ref, pool_ref,
                x_scratch):
    l = pl.program_id(1)
    f32 = jnp.float32
    bf16 = jnp.bfloat16

    # Layer 0: embedding LayerNorm initializes the resident activation slab.
    @pl.when(l == 0)
    def _():
        x_scratch[...] = _layernorm(emb_ref[...], emb_g_ref[...], emb_b_ref[...])

    x = x_scratch[...]                       # (S, H) f32 residual stream
    x_bf = x.astype(bf16)
    key_bias = mask_ref[...]                 # (1, S) f32, -10000 on padded keys

    # ---- self-attention: per-head weight stacks, bf16 MXU operands, f32 accum ----
    attn = jnp.zeros((SEQ, HIDDEN), f32)
    for h in range(N_HEADS):                 # static unroll: heads are few
        q = jnp.dot(x_bf, wq_ref[h], preferred_element_type=f32) + bq_ref[h]
        k = jnp.dot(x_bf, wk_ref[h], preferred_element_type=f32) + bk_ref[h]
        v = jnp.dot(x_bf, wv_ref[h], preferred_element_type=f32) + bv_ref[h]
        # scores = q @ k^T ; 1/sqrt(head_dim) already folded into Wq/bq
        s = lax.dot_general(q.astype(bf16), k.astype(bf16),
                            (((1,), (1,)), ((), ())),
                            preferred_element_type=f32)          # (S, S)
        s = s + key_bias                                          # broadcast over query rows
        s = s - jnp.max(s, axis=-1, keepdims=True)                # stable softmax (f32)
        p = jnp.exp(s)
        p = p * pl.reciprocal(jnp.sum(p, axis=-1, keepdims=True), approx=True)
        ctx = jnp.dot(p.astype(bf16), v.astype(bf16),
                      preferred_element_type=f32)                 # (S, D)
        # accumulate the per-head output projection straight into the (S, H) slab
        attn = attn + jnp.dot(ctx.astype(bf16), wo_ref[h],
                              preferred_element_type=f32)
    attn = attn + bo_ref[...]
    h1 = _layernorm(x + attn, ln1g_ref[...], ln1b_ref[...])

    # ---- FFN ----
    ffn = _gelu(jnp.dot(h1.astype(bf16), wi_ref[...],
                        preferred_element_type=f32) + bi_ref[...])
    ffn = jnp.dot(ffn.astype(bf16), wo2_ref[...],
                  preferred_element_type=f32) + bo2_ref[...]
    x_new = _layernorm(h1 + ffn, ln2g_ref[...], ln2b_ref[...])
    x_scratch[...] = x_new

    # Last layer: emit sequence output and pooler([CLS]).
    @pl.when(l == pl.num_programs(1) - 1)
    def _():
        seq_ref[...] = x_new
        cls = x_new[0:1, :]                                        # [CLS] row, no gather
        pool_ref[...] = jnp.tanh(
            jnp.dot(cls.astype(bf16), pw_ref[...],
                    preferred_element_type=f32) + pb_ref[...])


# ---------------- parameters ----------------

def init_params(key):
    def nrm(k, shape):
        return 0.02 * jax.random.normal(k, shape, jnp.float32)

    H, D, NH, I = HIDDEN, HEAD_DIM, N_HEADS, INTERMEDIATE
    scale = 1.0 / math.sqrt(D)
    keys = jax.random.split(key, 4 + N_LAYERS)
    params = {
        'word_emb': nrm(keys[0], (VOCAB, H)),
        'pos_emb': nrm(keys[1], (MAX_POS, H)),
        'type_emb': nrm(keys[2], (TYPE_VOCAB, H)),
        'emb_ln_g': jnp.ones((1, H), jnp.float32),
        'emb_ln_b': jnp.zeros((1, H), jnp.float32),
        'pooler_w': nrm(keys[3], (H, H)).astype(jnp.bfloat16),
        'pooler_b': jnp.zeros((1, H), jnp.float32),
    }
    wq, bq, wk, bk, wv, bv = [], [], [], [], [], []
    wo, bo, ln1g, ln1b = [], [], [], []
    wi, bi, wo2, bo2, ln2g, ln2b = [], [], [], [], [], []
    for li in range(N_LAYERS):
        lk = jax.random.split(keys[4 + li], 6)
        # per-head weight stacks; 1/sqrt(head_dim) folded into Wq (and bq)
        wq.append((scale * nrm(lk[0], (NH, H, D))).astype(jnp.bfloat16))
        bq.append(jnp.zeros((NH, 1, D), jnp.float32))   # scale fold is a no-op on zero bias
        wk.append(nrm(lk[1], (NH, H, D)).astype(jnp.bfloat16))
        bk.append(jnp.zeros((NH, 1, D), jnp.float32))
        wv.append(nrm(lk[2], (NH, H, D)).astype(jnp.bfloat16))
        bv.append(jnp.zeros((NH, 1, D), jnp.float32))
        wo.append(nrm(lk[3], (NH, D, H)).astype(jnp.bfloat16))
        bo.append(jnp.zeros((1, H), jnp.float32))
        ln1g.append(jnp.ones((1, H), jnp.float32))
        ln1b.append(jnp.zeros((1, H), jnp.float32))
        wi.append(nrm(lk[4], (H, I)).astype(jnp.bfloat16))
        bi.append(jnp.zeros((1, I), jnp.float32))
        wo2.append(nrm(lk[5], (I, H)).astype(jnp.bfloat16))
        bo2.append(jnp.zeros((1, H), jnp.float32))
        ln2g.append(jnp.ones((1, H), jnp.float32))
        ln2b.append(jnp.zeros((1, H), jnp.float32))

    stack = lambda xs: jnp.stack(xs, axis=0)
    params.update(
        wq=stack(wq), bq=stack(bq), wk=stack(wk), bk=stack(bk),
        wv=stack(wv), bv=stack(bv), wo=stack(wo), bo=stack(bo),
        ln1g=stack(ln1g), ln1b=stack(ln1b),
        wi=stack(wi), bi=stack(bi), wo2=stack(wo2), bo2=stack(bo2),
        ln2g=stack(ln2g), ln2b=stack(ln2b))
    return params


# ---------------- forward wrapper ----------------

def bert_forward(params, input_ids, segment_ids, padding_mask):
    B, S = input_ids.shape
    H, L, NH, D, I = HIDDEN, N_LAYERS, N_HEADS, HEAD_DIM, INTERMEDIATE

    # BertEmbeddings gathers are XLA glue; everything else is one Pallas call.
    pos_ids = jnp.arange(S)
    emb = (jnp.take(params['word_emb'], input_ids, axis=0)
           + jnp.take(params['pos_emb'], pos_ids, axis=0)[None, :, :]
           + jnp.take(params['type_emb'], segment_ids, axis=0))       # (B, S, H) f32

    # HF extended attention mask, key-only (B, 1, S); broadcast over query rows
    # happens inside the kernel (no SxS redundancy DMA'd from HBM).
    key_bias = ((1.0 - padding_mask.astype(jnp.float32)) * -10000.0)[:, None, :]

    def per_layer(arr):      # one layer per grid step along axis 1 (double-buffered)
        nd = arr.ndim - 1
        return pl.BlockSpec((None,) + arr.shape[1:],
                            lambda b, l, nd=nd: (l,) + (0,) * nd)

    def per_batch(arr):      # one batch element per grid step along axis 0
        nd = arr.ndim - 1
        return pl.BlockSpec((None,) + arr.shape[1:],
                            lambda b, l, nd=nd: (b,) + (0,) * nd)

    def shared(arr):         # same (resident) block for every grid step
        nd = arr.ndim
        return pl.BlockSpec(arr.shape, lambda b, l, nd=nd: (0,) * nd)

    inputs = (emb, key_bias, params['emb_ln_g'], params['emb_ln_b'],
              params['wq'], params['bq'], params['wk'], params['bk'],
              params['wv'], params['bv'], params['wo'], params['bo'],
              params['ln1g'], params['ln1b'],
              params['wi'], params['bi'], params['wo2'], params['bo2'],
              params['ln2g'], params['ln2b'],
              params['pooler_w'], params['pooler_b'])
    in_specs = [per_batch(emb), per_batch(key_bias),
                shared(params['emb_ln_g']), shared(params['emb_ln_b'])]
    in_specs += [per_layer(params[k]) for k in
                 ('wq', 'bq', 'wk', 'bk', 'wv', 'bv', 'wo', 'bo',
                  'ln1g', 'ln1b', 'wi', 'bi', 'wo2', 'bo2', 'ln2g', 'ln2b')]
    in_specs += [shared(params['pooler_w']), shared(params['pooler_b'])]

    # Advisory cost estimate so XLA can schedule the embedding gathers around
    # the long fused custom call.
    flops_layer = (3 * NH * 2 * S * H * D            # Q/K/V projections
                   + NH * 2 * S * S * D * 2          # scores + context
                   + NH * 2 * S * D * H              # per-head output projection
                   + 2 * 2 * S * H * I)              # FFN
    flops = B * L * flops_layer + B * 2 * H * H
    transcendentals = B * L * (NH * S * S + S * I) + B * H
    bytes_accessed = (sum(int(a.size) * a.dtype.itemsize for a in inputs)
                      + B * S * H * 4 + B * H * 4)

    seq_out, pooled = pl.pallas_call(
        bert_kernel,
        out_shape=(jax.ShapeDtypeStruct((B, S, H), jnp.float32),
                   jax.ShapeDtypeStruct((B, 1, H), jnp.float32)),
        grid_spec=pltpu.PrefetchScalarGridSpec(
            num_scalar_prefetch=0,
            grid=(B, L),                             # batch parallel, layers pipelined
            in_specs=in_specs,
            out_specs=(pl.BlockSpec((None, S, H), lambda b, l: (b, 0, 0)),
                       pl.BlockSpec((None, 1, H), lambda b, l: (b, 0, 0))),
            scratch_shapes=[pltpu.VMEM((S, H), jnp.float32)]),
        compiler_params=pltpu.CompilerParams(
            dimension_semantics=("parallel", "arbitrary"),
            vmem_limit_bytes=64 * 1024 * 1024),
        cost_estimate=pl.CostEstimate(flops=int(flops),
                                      transcendentals=int(transcendentals),
                                      bytes_accessed=int(bytes_accessed)),
    )(*inputs)

    sequence_output = seq_out                        # (B, S, H)
    pooled_output = pooled.reshape(B, H)             # (B, H)
    return sequence_output, pooled_output


if __name__ == "__main__":
    key = jax.random.PRNGKey(0)
    k_param, k_ids = jax.random.split(key)
    params = init_params(k_param)

    input_ids = jax.random.randint(k_ids, (BATCH, SEQ), 0, VOCAB, dtype=jnp.int32)
    segment_ids = jnp.concatenate(
        [jnp.zeros((BATCH, SEQ // 2), jnp.int32),
         jnp.ones((BATCH, SEQ // 2), jnp.int32)], axis=1)
    # second example has two trailing padding tokens
    padding_mask = jnp.array([[1] * SEQ, [1] * (SEQ - 2) + [0, 0]], dtype=jnp.int32)

    fwd = jax.jit(bert_forward)
    sequence_output, pooled_output = fwd(params, input_ids, segment_ids, padding_mask)
    jax.block_until_ready((sequence_output, pooled_output))

    assert sequence_output.shape == (BATCH, SEQ, HIDDEN)
    assert pooled_output.shape == (BATCH, HIDDEN)
    assert bool(jnp.all(jnp.isfinite(sequence_output)))
    assert bool(jnp.all(jnp.isfinite(pooled_output)))
    print("KERNEL_OK")
</pallas_src>

<mosaic_0001>
module attributes {stable_mosaic.version = 11 : i64} {
  func.func @bert_kernel(%arg0: i32, %arg1: i32, %arg2: memref<1x8x32xf32, #tpu.memory_space<vmem>>, %arg3: memref<1x1x8xf32, #tpu.memory_space<vmem>>, %arg4: memref<1x32xf32, #tpu.memory_space<vmem>>, %arg5: memref<1x32xf32, #tpu.memory_space<vmem>>, %arg6: memref<1x2x32x16xbf16, #tpu.memory_space<vmem>>, %arg7: memref<1x2x1x16xf32, #tpu.memory_space<vmem>>, %arg8: memref<1x2x32x16xbf16, #tpu.memory_space<vmem>>, %arg9: memref<1x2x1x16xf32, #tpu.memory_space<vmem>>, %arg10: memref<1x2x32x16xbf16, #tpu.memory_space<vmem>>, %arg11: memref<1x2x1x16xf32, #tpu.memory_space<vmem>>, %arg12: memref<1x2x16x32xbf16, #tpu.memory_space<vmem>>, %arg13: memref<1x1x32xf32, #tpu.memory_space<vmem>>, %arg14: memref<1x1x32xf32, #tpu.memory_space<vmem>>, %arg15: memref<1x1x32xf32, #tpu.memory_space<vmem>>, %arg16: memref<1x32x64xbf16, #tpu.memory_space<vmem>>, %arg17: memref<1x1x64xf32, #tpu.memory_space<vmem>>, %arg18: memref<1x64x32xbf16, #tpu.memory_space<vmem>>, %arg19: memref<1x1x32xf32, #tpu.memory_space<vmem>>, %arg20: memref<1x1x32xf32, #tpu.memory_space<vmem>>, %arg21: memref<1x1x32xf32, #tpu.memory_space<vmem>>, %arg22: memref<32x32xbf16, #tpu.memory_space<vmem>>, %arg23: memref<1x32xf32, #tpu.memory_space<vmem>>, %arg24: memref<1x8x32xf32, #tpu.memory_space<vmem>>, %arg25: memref<1x1x32xf32, #tpu.memory_space<vmem>>, %arg26: memref<8x32xf32, #tpu.memory_space<vmem>>) attributes {dimension_semantics = [#tpu.dimension_semantics<parallel>, #tpu.dimension_semantics<arbitrary>], iteration_bounds = array<i64: 2, 2>, scalar_prefetch = 0 : i64, scratch_operands = 1 : i64, tpu.core_type = #tpu.core_type<tc>, window_params = [{transform_indices = @transform_0, window_bounds = array<i64: 1, 8, 32>}, {transform_indices = @transform_1, window_bounds = array<i64: 1, 1, 8>}, {pipeline_mode = #tpu.pipeline_mode<synchronous>, transform_indices = @transform_2, window_bounds = array<i64: 1, 32>}, {pipeline_mode = #tpu.pipeline_mode<synchronous>, transform_indices = @transform_3, window_bounds = array<i64: 1, 32>}, {transform_indices = @transform_4, window_bounds = array<i64: 1, 2, 32, 16>}, {transform_indices = @transform_5, window_bounds = array<i64: 1, 2, 1, 16>}, {transform_indices = @transform_6, window_bounds = array<i64: 1, 2, 32, 16>}, {transform_indices = @transform_7, window_bounds = array<i64: 1, 2, 1, 16>}, {transform_indices = @transform_8, window_bounds = array<i64: 1, 2, 32, 16>}, {transform_indices = @transform_9, window_bounds = array<i64: 1, 2, 1, 16>}, {transform_indices = @transform_10, window_bounds = array<i64: 1, 2, 16, 32>}, {transform_indices = @transform_11, window_bounds = array<i64: 1, 1, 32>}, {transform_indices = @transform_12, window_bounds = array<i64: 1, 1, 32>}, {transform_indices = @transform_13, window_bounds = array<i64: 1, 1, 32>}, {transform_indices = @transform_14, window_bounds = array<i64: 1, 32, 64>}, {transform_indices = @transform_15, window_bounds = array<i64: 1, 1, 64>}, {transform_indices = @transform_16, window_bounds = array<i64: 1, 64, 32>}, {transform_indices = @transform_17, window_bounds = array<i64: 1, 1, 32>}, {transform_indices = @transform_18, window_bounds = array<i64: 1, 1, 32>}, {transform_indices = @transform_19, window_bounds = array<i64: 1, 1, 32>}, {pipeline_mode = #tpu.pipeline_mode<synchronous>, transform_indices = @transform_20, window_bounds = array<i64: 32, 32>}, {pipeline_mode = #tpu.pipeline_mode<synchronous>, transform_indices = @transform_21, window_bounds = array<i64: 1, 32>}, {transform_indices = @transform_22, window_bounds = array<i64: 1, 8, 32>}, {transform_indices = @transform_23, window_bounds = array<i64: 1, 1, 32>}]} {
    %c0_i32 = arith.constant 0 : i32
    %0 = arith.cmpi eq, %arg1, %c0_i32 : i32
    %1 = arith.extui %0 : i1 to i32
    %c0_i32_0 = arith.constant 0 : i32
    %2 = arith.cmpi ne, %1, %c0_i32_0 : i32
    scf.if %2 {
      %c0_122 = arith.constant 0 : index
      %c0_123 = arith.constant 0 : index
      %c0_124 = arith.constant 0 : index
      %183 = vector.load %arg2[%c0_122, %c0_123, %c0_124] : memref<1x8x32xf32, #tpu.memory_space<vmem>>, vector<1x8x32xf32>
      %184 = vector.shape_cast %183 : vector<1x8x32xf32> to vector<8x32xf32>
      %c0_125 = arith.constant 0 : index
      %c0_126 = arith.constant 0 : index
      %185 = vector.load %arg4[%c0_125, %c0_126] : memref<1x32xf32, #tpu.memory_space<vmem>>, vector<1x32xf32>
      %c0_127 = arith.constant 0 : index
      %c0_128 = arith.constant 0 : index
      %186 = vector.load %arg5[%c0_127, %c0_128] : memref<1x32xf32, #tpu.memory_space<vmem>>, vector<1x32xf32>
      %cst_129 = arith.constant dense<0.000000e+00> : vector<8xf32>
      %187 = vector.multi_reduction <add>, %184, %cst_129 [1] : vector<8x32xf32> to vector<8xf32>
      %188 = vector.shape_cast %187 : vector<8xf32> to vector<8x1xf32>
      %cst_130 = arith.constant 3.200000e+01 : f32
      %189 = vector.broadcast %cst_130 : f32 to vector<8x1xf32>
      %190 = arith.divf %188, %189 : vector<8x1xf32>
      %191 = vector.broadcast %190 : vector<8x1xf32> to vector<8x32xf32>
      %192 = arith.subf %184, %191 : vector<8x32xf32>
      %193 = arith.mulf %192, %192 : vector<8x32xf32>
      %cst_131 = arith.constant dense<0.000000e+00> : vector<8xf32>
      %194 = vector.multi_reduction <add>, %193, %cst_131 [1] : vector<8x32xf32> to vector<8xf32>
      %195 = vector.shape_cast %194 : vector<8xf32> to vector<8x1xf32>
      %cst_132 = arith.constant 3.200000e+01 : f32
      %196 = vector.broadcast %cst_132 : f32 to vector<8x1xf32>
      %197 = arith.divf %195, %196 : vector<8x1xf32>
      %cst_133 = arith.constant 9.99999996E-13 : f32
      %198 = vector.broadcast %cst_133 : f32 to vector<8x1xf32>
      %199 = arith.addf %197, %198 : vector<8x1xf32>
      %200 = math.rsqrt %199 : vector<8x1xf32>
      %201 = vector.broadcast %200 : vector<8x1xf32> to vector<8x32xf32>
      %202 = arith.mulf %192, %201 : vector<8x32xf32>
      %203 = vector.broadcast %185 : vector<1x32xf32> to vector<8x32xf32>
      %204 = arith.mulf %202, %203 : vector<8x32xf32>
      %205 = vector.broadcast %186 : vector<1x32xf32> to vector<8x32xf32>
      %206 = arith.addf %204, %205 : vector<8x32xf32>
      %c0_134 = arith.constant 0 : index
      %c0_135 = arith.constant 0 : index
      %207 = vector.load %arg26[%c0_134, %c0_135] : memref<8x32xf32, #tpu.memory_space<vmem>>, vector<8x32xf32>
      tpu.vector_store %arg26[%c0_134, %c0_135], %206 {strides = array<i32>} : memref<8x32xf32, #tpu.memory_space<vmem>>, vector<8x32xf32>,
    } else {
    }
    %c0 = arith.constant 0 : index
    %c0_1 = arith.constant 0 : index
    %3 = vector.load %arg26[%c0, %c0_1] : memref<8x32xf32, #tpu.memory_space<vmem>>, vector<8x32xf32>
    %4 = arith.truncf %3 : vector<8x32xf32> to vector<8x32xbf16>
    %c0_2 = arith.constant 0 : index
    %c0_3 = arith.constant 0 : index
    %c0_4 = arith.constant 0 : index
    %5 = vector.load %arg3[%c0_2, %c0_3, %c0_4] : memref<1x1x8xf32, #tpu.memory_space<vmem>>, vector<1x1x8xf32>
    %6 = vector.shape_cast %5 : vector<1x1x8xf32> to vector<1x8xf32>
    %cst = arith.constant 0.000000e+00 : f32
    %7 = vector.broadcast %cst : f32 to vector<8x32xf32>
    %c0_5 = arith.constant 0 : index
    %c0_6 = arith.constant 0 : index
    %c0_7 = arith.constant 0 : index
    %c0_8 = arith.constant 0 : index
    %8 = vector.load %arg6[%c0_5, %c0_6, %c0_7, %c0_8] : memref<1x2x32x16xbf16, #tpu.memory_space<vmem>>, vector<1x1x32x16xbf16>
    %9 = vector.shape_cast %8 : vector<1x1x32x16xbf16> to vector<32x16xbf16>
    %cst_9 = arith.constant dense<0.000000e+00> : vector<8x16xf32>
    %10 = tpu.matmul %4, %9, %cst_9 {dimension_numbers = #tpu.dot_dimension_numbers<[1], [0], [0], [1], [0, 0, 1, 1], [], []>} : vector<8x32xbf16>, vector<32x16xbf16>, vector<8x16xf32> -> vector<8x16xf32>
    %c0_10 = arith.constant 0 : index
    %c0_11 = arith.constant 0 : index
    %c0_12 = arith.constant 0 : index
    %c0_13 = arith.constant 0 : index
    %11 = vector.load %arg7[%c0_10, %c0_11, %c0_12, %c0_13] : memref<1x2x1x16xf32, #tpu.memory_space<vmem>>, vector<1x1x1x16xf32>
    %12 = vector.shape_cast %11 : vector<1x1x1x16xf32> to vector<1x16xf32>
    %13 = vector.broadcast %12 : vector<1x16xf32> to vector<8x16xf32>
    %14 = arith.addf %10, %13 : vector<8x16xf32>
    %c0_14 = arith.constant 0 : index
    %c0_15 = arith.constant 0 : index
    %c0_16 = arith.constant 0 : index
    %c0_17 = arith.constant 0 : index
    %15 = vector.load %arg8[%c0_14, %c0_15, %c0_16, %c0_17] : memref<1x2x32x16xbf16, #tpu.memory_space<vmem>>, vector<1x1x32x16xbf16>
    %16 = vector.shape_cast %15 : vector<1x1x32x16xbf16> to vector<32x16xbf16>
    %cst_18 = arith.constant dense<0.000000e+00> : vector<8x16xf32>
    %17 = tpu.matmul %4, %16, %cst_18 {dimension_numbers = #tpu.dot_dimension_numbers<[1], [0], [0], [1], [0, 0, 1, 1], [], []>} : vector<8x32xbf16>, vector<32x16xbf16>, vector<8x16xf32> -> vector<8x16xf32>
    %c0_19 = arith.constant 0 : index
    %c0_20 = arith.constant 0 : index
    %c0_21 = arith.constant 0 : index
    %c0_22 = arith.constant 0 : index
    %18 = vector.load %arg9[%c0_19, %c0_20, %c0_21, %c0_22] : memref<1x2x1x16xf32, #tpu.memory_space<vmem>>, vector<1x1x1x16xf32>
    %19 = vector.shape_cast %18 : vector<1x1x1x16xf32> to vector<1x16xf32>
    %20 = vector.broadcast %19 : vector<1x16xf32> to vector<8x16xf32>
    %21 = arith.addf %17, %20 : vector<8x16xf32>
    %c0_23 = arith.constant 0 : index
    %c0_24 = arith.constant 0 : index
    %c0_25 = arith.constant 0 : index
    %c0_26 = arith.constant 0 : index
    %22 = vector.load %arg10[%c0_23, %c0_24, %c0_25, %c0_26] : memref<1x2x32x16xbf16, #tpu.memory_space<vmem>>, vector<1x1x32x16xbf16>
    %23 = vector.shape_cast %22 : vector<1x1x32x16xbf16> to vector<32x16xbf16>
    %cst_27 = arith.constant dense<0.000000e+00> : vector<8x16xf32>
    %24 = tpu.matmul %4, %23, %cst_27 {dimension_numbers = #tpu.dot_dimension_numbers<[1], [0], [0], [1], [0, 0, 1, 1], [], []>} : vector<8x32xbf16>, vector<32x16xbf16>, vector<8x16xf32> -> vector<8x16xf32>
    %c0_28 = arith.constant 0 : index
    %c0_29 = arith.constant 0 : index
    %c0_30 = arith.constant 0 : index
    %c0_31 = arith.constant 0 : index
    %25 = vector.load %arg11[%c0_28, %c0_29, %c0_30, %c0_31] : memref<1x2x1x16xf32, #tpu.memory_space<vmem>>, vector<1x1x1x16xf32>
    %26 = vector.shape_cast %25 : vector<1x1x1x16xf32> to vector<1x16xf32>
    %27 = vector.broadcast %26 : vector<1x16xf32> to vector<8x16xf32>
    %28 = arith.addf %24, %27 : vector<8x16xf32>
    %29 = arith.truncf %14 : vector<8x16xf32> to vector<8x16xbf16>
    %30 = arith.truncf %21 : vector<8x16xf32> to vector<8x16xbf16>
    %cst_32 = arith.constant dense<0.000000e+00> : vector<8x8xf32>
    %31 = tpu.matmul %29, %30, %cst_32 {dimension_numbers = #tpu.dot_dimension_numbers<[1], [1], [0], [0], [0, 0, 1, 0], [], []>} : vector<8x16xbf16>, vector<8x16xbf16>, vector<8x8xf32> -> vector<8x8xf32>
    %32 = vector.broadcast %6 : vector<1x8xf32> to vector<8x8xf32>
    %33 = arith.addf %31, %32 : vector<8x8xf32>
    %cst_33 = arith.constant dense<0xFF800000> : vector<8xf32>
    %34 = vector.multi_reduction <maximumf>, %33, %cst_33 [1] : vector<8x8xf32> to vector<8xf32>
    %35 = vector.shape_cast %34 : vector<8xf32> to vector<8x1xf32>
    %36 = vector.broadcast %35 : vector<8x1xf32> to vector<8x8xf32>
    %37 = arith.subf %33, %36 : vector<8x8xf32>
    %38 = math.exp %37 : vector<8x8xf32>
    %cst_34 = arith.constant dense<0.000000e+00> : vector<8xf32>
    %39 = vector.multi_reduction <add>, %38, %cst_34 [1] : vector<8x8xf32> to vector<8xf32>
    %40 = vector.shape_cast %39 : vector<8xf32> to vector<8x1xf32>
    %41 = tpu.reciprocal %40 {approx = true} : vector<8x1xf32> -> vector<8x1xf32>
    %42 = vector.broadcast %41 : vector<8x1xf32> to vector<8x8xf32>
    %43 = arith.mulf %38, %42 : vector<8x8xf32>
    %44 = arith.truncf %43 : vector<8x8xf32> to vector<8x8xbf16>
    %45 = arith.truncf %28 : vector<8x16xf32> to vector<8x16xbf16>
    %cst_35 = arith.constant dense<0.000000e+00> : vector<8x16xf32>
    %46 = tpu.matmul %44, %45, %cst_35 {dimension_numbers = #tpu.dot_dimension_numbers<[1], [0], [0], [1], [0, 0, 1, 1], [], []>} : vector<8x8xbf16>, vector<8x16xbf16>, vector<8x16xf32> -> vector<8x16xf32>
    %47 = arith.truncf %46 : vector<8x16xf32> to vector<8x16xbf16>
    %c0_36 = arith.constant 0 : index
    %c0_37 = arith.constant 0 : index
    %c0_38 = arith.constant 0 : index
    %c0_39 = arith.constant 0 : index
    %48 = vector.load %arg12[%c0_36, %c0_37, %c0_38, %c0_39] : memref<1x2x16x32xbf16, #tpu.memory_space<vmem>>, vector<1x1x16x32xbf16>
    %49 = vector.shape_cast %48 : vector<1x1x16x32xbf16> to vector<16x32xbf16>
    %cst_40 = arith.constant dense<0.000000e+00> : vector<8x32xf32>
    %50 = tpu.matmul %47, %49, %cst_40 {dimension_numbers = #tpu.dot_dimension_numbers<[1], [0], [0], [1], [0, 0, 1, 1], [], []>} : vector<8x16xbf16>, vector<16x32xbf16>, vector<8x32xf32> -> vector<8x32xf32>
    %51 = arith.addf %7, %50 : vector<8x32xf32>
    %c0_41 = arith.constant 0 : index
    %c1 = arith.constant 1 : index
    %c0_42 = arith.constant 0 : index
    %c0_43 = arith.constant 0 : index
    %52 = vector.load %arg6[%c0_41, %c1, %c0_42, %c0_43] : memref<1x2x32x16xbf16, #tpu.memory_space<vmem>>, vector<1x1x32x16xbf16>
    %53 = vector.shape_cast %52 : vector<1x1x32x16xbf16> to vector<32x16xbf16>
    %cst_44 = arith.constant dense<0.000000e+00> : vector<8x16xf32>
    %54 = tpu.matmul %4, %53, %cst_44 {dimension_numbers = #tpu.dot_dimension_numbers<[1], [0], [0], [1], [0, 0, 1, 1], [], []>} : vector<8x32xbf16>, vector<32x16xbf16>, vector<8x16xf32> -> vector<8x16xf32>
    %c0_45 = arith.constant 0 : index
    %c1_46 = arith.constant 1 : index
    %c0_47 = arith.constant 0 : index
    %c0_48 = arith.constant 0 : index
    %55 = vector.load %arg7[%c0_45, %c1_46, %c0_47, %c0_48] : memref<1x2x1x16xf32, #tpu.memory_space<vmem>>, vector<1x1x1x16xf32>
    %56 = vector.shape_cast %55 : vector<1x1x1x16xf32> to vector<1x16xf32>
    %57 = vector.broadcast %56 : vector<1x16xf32> to vector<8x16xf32>
    %58 = arith.addf %54, %57 : vector<8x16xf32>
    %c0_49 = arith.constant 0 : index
    %c1_50 = arith.constant 1 : index
    %c0_51 = arith.constant 0 : index
    %c0_52 = arith.constant 0 : index
    %59 = vector.load %arg8[%c0_49, %c1_50, %c0_51, %c0_52] : memref<1x2x32x16xbf16, #tpu.memory_space<vmem>>, vector<1x1x32x16xbf16>
    %60 = vector.shape_cast %59 : vector<1x1x32x16xbf16> to vector<32x16xbf16>
    %cst_53 = arith.constant dense<0.000000e+00> : vector<8x16xf32>
    %61 = tpu.matmul %4, %60, %cst_53 {dimension_numbers = #tpu.dot_dimension_numbers<[1], [0], [0], [1], [0, 0, 1, 1], [], []>} : vector<8x32xbf16>, vector<32x16xbf16>, vector<8x16xf32> -> vector<8x16xf32>
    %c0_54 = arith.constant 0 : index
    %c1_55 = arith.constant 1 : index
    %c0_56 = arith.constant 0 : index
    %c0_57 = arith.constant 0 : index
    %62 = vector.load %arg9[%c0_54, %c1_55, %c0_56, %c0_57] : memref<1x2x1x16xf32, #tpu.memory_space<vmem>>, vector<1x1x1x16xf32>
    %63 = vector.shape_cast %62 : vector<1x1x1x16xf32> to vector<1x16xf32>
    %64 = vector.broadcast %63 : vector<1x16xf32> to vector<8x16xf32>
    %65 = arith.addf %61, %64 : vector<8x16xf32>
    %c0_58 = arith.constant 0 : index
    %c1_59 = arith.constant 1 : index
    %c0_60 = arith.constant 0 : index
    %c0_61 = arith.constant 0 : index
    %66 = vector.load %arg10[%c0_58, %c1_59, %c0_60, %c0_61] : memref<1x2x32x16xbf16, #tpu.memory_space<vmem>>, vector<1x1x32x16xbf16>
    %67 = vector.shape_cast %66 : vector<1x1x32x16xbf16> to vector<32x16xbf16>
    %cst_62 = arith.constant dense<0.000000e+00> : vector<8x16xf32>
    %68 = tpu.matmul %4, %67, %cst_62 {dimension_numbers = #tpu.dot_dimension_numbers<[1], [0], [0], [1], [0, 0, 1, 1], [], []>} : vector<8x32xbf16>, vector<32x16xbf16>, vector<8x16xf32> -> vector<8x16xf32>
    %c0_63 = arith.constant 0 : index
    %c1_64 = arith.constant 1 : index
    %c0_65 = arith.constant 0 : index
    %c0_66 = arith.constant 0 : index
    %69 = vector.load %arg11[%c0_63, %c1_64, %c0_65, %c0_66] : memref<1x2x1x16xf32, #tpu.memory_space<vmem>>, vector<1x1x1x16xf32>
    %70 = vector.shape_cast %69 : vector<1x1x1x16xf32> to vector<1x16xf32>
    %71 = vector.broadcast %70 : vector<1x16xf32> to vector<8x16xf32>
    %72 = arith.addf %68, %71 : vector<8x16xf32>
    %73 = arith.truncf %58 : vector<8x16xf32> to vector<8x16xbf16>
    %74 = arith.truncf %65 : vector<8x16xf32> to vector<8x16xbf16>
    %cst_67 = arith.constant dense<0.000000e+00> : vector<8x8xf32>
    %75 = tpu.matmul %73, %74, %cst_67 {dimension_numbers = #tpu.dot_dimension_numbers<[1], [1], [0], [0], [0, 0, 1, 0], [], []>} : vector<8x16xbf16>, vector<8x16xbf16>, vector<8x8xf32> -> vector<8x8xf32>
    %76 = vector.broadcast %6 : vector<1x8xf32> to vector<8x8xf32>
    %77 = arith.addf %75, %76 : vector<8x8xf32>
    %cst_68 = arith.constant dense<0xFF800000> : vector<8xf32>
    %78 = vector.multi_reduction <maximumf>, %77, %cst_68 [1] : vector<8x8xf32> to vector<8xf32>
    %79 = vector.shape_cast %78 : vector<8xf32> to vector<8x1xf32>
    %80 = vector.broadcast %79 : vector<8x1xf32> to vector<8x8xf32>
    %81 = arith.subf %77, %80 : vector<8x8xf32>
    %82 = math.exp %81 : vector<8x8xf32>
    %cst_69 = arith.constant dense<0.000000e+00> : vector<8xf32>
    %83 = vector.multi_reduction <add>, %82, %cst_69 [1] : vector<8x8xf32> to vector<8xf32>
    %84 = vector.shape_cast %83 : vector<8xf32> to vector<8x1xf32>
    %85 = tpu.reciprocal %84 {approx = true} : vector<8x1xf32> -> vector<8x1xf32>
    %86 = vector.broadcast %85 : vector<8x1xf32> to vector<8x8xf32>
    %87 = arith.mulf %82, %86 : vector<8x8xf32>
    %88 = arith.truncf %87 : vector<8x8xf32> to vector<8x8xbf16>
    %89 = arith.truncf %72 : vector<8x16xf32> to vector<8x16xbf16>
    %cst_70 = arith.constant dense<0.000000e+00> : vector<8x16xf32>
    %90 = tpu.matmul %88, %89, %cst_70 {dimension_numbers = #tpu.dot_dimension_numbers<[1], [0], [0], [1], [0, 0, 1, 1], [], []>} : vector<8x8xbf16>, vector<8x16xbf16>, vector<8x16xf32> -> vector<8x16xf32>
    %91 = arith.truncf %90 : vector<8x16xf32> to vector<8x16xbf16>
    %c0_71 = arith.constant 0 : index
    %c1_72 = arith.constant 1 : index
    %c0_73 = arith.constant 0 : index
    %c0_74 = arith.constant 0 : index
    %92 = vector.load %arg12[%c0_71, %c1_72, %c0_73, %c0_74] : memref<1x2x16x32xbf16, #tpu.memory_space<vmem>>, vector<1x1x16x32xbf16>
    %93 = vector.shape_cast %92 : vector<1x1x16x32xbf16> to vector<16x32xbf16>
    %cst_75 = arith.constant dense<0.000000e+00> : vector<8x32xf32>
    %94 = tpu.matmul %91, %93, %cst_75 {dimension_numbers = #tpu.dot_dimension_numbers<[1], [0], [0], [1], [0, 0, 1, 1], [], []>} : vector<8x16xbf16>, vector<16x32xbf16>, vector<8x32xf32> -> vector<8x32xf32>
    %95 = arith.addf %51, %94 : vector<8x32xf32>
    %c0_76 = arith.constant 0 : index
    %c0_77 = arith.constant 0 : index
    %c0_78 = arith.constant 0 : index
    %96 = vector.load %arg13[%c0_76, %c0_77, %c0_78] : memref<1x1x32xf32, #tpu.memory_space<vmem>>, vector<1x1x32xf32>
    %97 = vector.shape_cast %96 : vector<1x1x32xf32> to vector<1x32xf32>
    %98 = vector.broadcast %97 : vector<1x32xf32> to vector<8x32xf32>
    %99 = arith.addf %95, %98 : vector<8x32xf32>
    %100 = arith.addf %3, %99 : vector<8x32xf32>
    %c0_79 = arith.constant 0 : index
    %c0_80 = arith.constant 0 : index
    %c0_81 = arith.constant 0 : index
    %101 = vector.load %arg14[%c0_79, %c0_80, %c0_81] : memref<1x1x32xf32, #tpu.memory_space<vmem>>, vector<1x1x32xf32>
    %102 = vector.shape_cast %101 : vector<1x1x32xf32> to vector<1x32xf32>
    %c0_82 = arith.constant 0 : index
    %c0_83 = arith.constant 0 : index
    %c0_84 = arith.constant 0 : index
    %103 = vector.load %arg15[%c0_82, %c0_83, %c0_84] : memref<1x1x32xf32, #tpu.memory_space<vmem>>, vector<1x1x32xf32>
    %104 = vector.shape_cast %103 : vector<1x1x32xf32> to vector<1x32xf32>
    %cst_85 = arith.constant dense<0.000000e+00> : vector<8xf32>
    %105 = vector.multi_reduction <add>, %100, %cst_85 [1] : vector<8x32xf32> to vector<8xf32>
    %106 = vector.shape_cast %105 : vector<8xf32> to vector<8x1xf32>
    %cst_86 = arith.constant 3.200000e+01 : f32
    %107 = vector.broadcast %cst_86 : f32 to vector<8x1xf32>
    %108 = arith.divf %106, %107 : vector<8x1xf32>
    %109 = vector.broadcast %108 : vector<8x1xf32> to vector<8x32xf32>
    %110 = arith.subf %100, %109 : vector<8x32xf32>
    %111 = arith.mulf %110, %110 : vector<8x32xf32>
    %cst_87 = arith.constant dense<0.000000e+00> : vector<8xf32>
    %112 = vector.multi_reduction <add>, %111, %cst_87 [1] : vector<8x32xf32> to vector<8xf32>
    %113 = vector.shape_cast %112 : vector<8xf32> to vector<8x1xf32>
    %cst_88 = arith.constant 3.200000e+01 : f32
    %114 = vector.broadcast %cst_88 : f32 to vector<8x1xf32>
    %115 = arith.divf %113, %114 : vector<8x1xf32>
    %cst_89 = arith.constant 9.99999996E-13 : f32
    %116 = vector.broadcast %cst_89 : f32 to vector<8x1xf32>
    %117 = arith.addf %115, %116 : vector<8x1xf32>
    %118 = math.rsqrt %117 : vector<8x1xf32>
    %119 = vector.broadcast %118 : vector<8x1xf32> to vector<8x32xf32>
    %120 = arith.mulf %110, %119 : vector<8x32xf32>
    %121 = vector.broadcast %102 : vector<1x32xf32> to vector<8x32xf32>
    %122 = arith.mulf %120, %121 : vector<8x32xf32>
    %123 = vector.broadcast %104 : vector<1x32xf32> to vector<8x32xf32>
    %124 = arith.addf %122, %123 : vector<8x32xf32>
    %125 = arith.truncf %124 : vector<8x32xf32> to vector<8x32xbf16>
    %c0_90 = arith.constant 0 : index
    %c0_91 = arith.constant 0 : index
    %c0_92 = arith.constant 0 : index
    %126 = vector.load %arg16[%c0_90, %c0_91, %c0_92] : memref<1x32x64xbf16, #tpu.memory_space<vmem>>, vector<1x32x64xbf16>
    %127 = vector.shape_cast %126 : vector<1x32x64xbf16> to vector<32x64xbf16>
    %cst_93 = arith.constant dense<0.000000e+00> : vector<8x64xf32>
    %128 = tpu.matmul %125, %127, %cst_93 {dimension_numbers = #tpu.dot_dimension_numbers<[1], [0], [0], [1], [0, 0, 1, 1], [], []>} : vector<8x32xbf16>, vector<32x64xbf16>, vector<8x64xf32> -> vector<8x64xf32>
    %c0_94 = arith.constant 0 : index
    %c0_95 = arith.constant 0 : index
    %c0_96 = arith.constant 0 : index
    %129 = vector.load %arg17[%c0_94, %c0_95, %c0_96] : memref<1x1x64xf32, #tpu.memory_space<vmem>>, vector<1x1x64xf32>
    %130 = vector.shape_cast %129 : vector<1x1x64xf32> to vector<1x64xf32>
    %131 = vector.broadcast %130 : vector<1x64xf32> to vector<8x64xf32>
    %132 = arith.addf %128, %131 : vector<8x64xf32>
    %cst_97 = arith.constant 5.000000e-01 : f32
    %133 = vector.broadcast %cst_97 : f32 to vector<8x64xf32>
    %134 = arith.mulf %133, %132 : vector<8x64xf32>
    %cst_98 = arith.constant 4.471500e-02 : f32
    %135 = vector.broadcast %cst_98 : f32 to vector<8x64xf32>
    %136 = arith.mulf %135, %132 : vector<8x64xf32>
    %137 = arith.mulf %136, %132 : vector<8x64xf32>
    %138 = arith.mulf %137, %132 : vector<8x64xf32>
    %139 = arith.addf %132, %138 : vector<8x64xf32>
    %cst_99 = arith.constant 0.797884583 : f32
    %140 = vector.broadcast %cst_99 : f32 to vector<8x64xf32>
    %141 = arith.mulf %140, %139 : vector<8x64xf32>
    %142 = math.tanh %141 : vector<8x64xf32>
    %cst_100 = arith.constant 1.000000e+00 : f32
    %143 = vector.broadcast %cst_100 : f32 to vector<8x64xf32>
    %144 = arith.addf %143, %142 : vector<8x64xf32>
    %145 = arith.mulf %134, %144 : vector<8x64xf32>
    %146 = arith.truncf %145 : vector<8x64xf32> to vector<8x64xbf16>
    %c0_101 = arith.constant 0 : index
    %c0_102 = arith.constant 0 : index
    %c0_103 = arith.constant 0 : index
    %147 = vector.load %arg18[%c0_101, %c0_102, %c0_103] : memref<1x64x32xbf16, #tpu.memory_space<vmem>>, vector<1x64x32xbf16>
    %148 = vector.shape_cast %147 : vector<1x64x32xbf16> to vector<64x32xbf16>
    %cst_104 = arith.constant dense<0.000000e+00> : vector<8x32xf32>
    %149 = tpu.matmul %146, %148, %cst_104 {dimension_numbers = #tpu.dot_dimension_numbers<[1], [0], [0], [1], [0, 0, 1, 1], [], []>} : vector<8x64xbf16>, vector<64x32xbf16>, vector<8x32xf32> -> vector<8x32xf32>
    %c0_105 = arith.constant 0 : index
    %c0_106 = arith.constant 0 : index
    %c0_107 = arith.constant 0 : index
    %150 = vector.load %arg19[%c0_105, %c0_106, %c0_107] : memref<1x1x32xf32, #tpu.memory_space<vmem>>, vector<1x1x32xf32>
    %151 = vector.shape_cast %150 : vector<1x1x32xf32> to vector<1x32xf32>
    %152 = vector.broadcast %151 : vector<1x32xf32> to vector<8x32xf32>
    %153 = arith.addf %149, %152 : vector<8x32xf32>
    %154 = arith.addf %124, %153 : vector<8x32xf32>
    %c0_108 = arith.constant 0 : index
    %c0_109 = arith.constant 0 : index
    %c0_110 = arith.constant 0 : index
    %155 = vector.load %arg20[%c0_108, %c0_109, %c0_110] : memref<1x1x32xf32, #tpu.memory_space<vmem>>, vector<1x1x32xf32>
    %156 = vector.shape_cast %155 : vector<1x1x32xf32> to vector<1x32xf32>
    %c0_111 = arith.constant 0 : index
    %c0_112 = arith.constant 0 : index
    %c0_113 = arith.constant 0 : index
    %157 = vector.load %arg21[%c0_111, %c0_112, %c0_113] : memref<1x1x32xf32, #tpu.memory_space<vmem>>, vector<1x1x32xf32>
    %158 = vector.shape_cast %157 : vector<1x1x32xf32> to vector<1x32xf32>
    %cst_114 = arith.constant dense<0.000000e+00> : vector<8xf32>
    %159 = vector.multi_reduction <add>, %154, %cst_114 [1] : vector<8x32xf32> to vector<8xf32>
    %160 = vector.shape_cast %159 : vector<8xf32> to vector<8x1xf32>
    %cst_115 = arith.constant 3.200000e+01 : f32
    %161 = vector.broadcast %cst_115 : f32 to vector<8x1xf32>
    %162 = arith.divf %160, %161 : vector<8x1xf32>
    %163 = vector.broadcast %162 : vector<8x1xf32> to vector<8x32xf32>
    %164 = arith.subf %154, %163 : vector<8x32xf32>
    %165 = arith.mulf %164, %164 : vector<8x32xf32>
    %cst_116 = arith.constant dense<0.000000e+00> : vector<8xf32>
    %166 = vector.multi_reduction <add>, %165, %cst_116 [1] : vector<8x32xf32> to vector<8xf32>
    %167 = vector.shape_cast %166 : vector<8xf32> to vector<8x1xf32>
    %cst_117 = arith.constant 3.200000e+01 : f32
    %168 = vector.broadcast %cst_117 : f32 to vector<8x1xf32>
    %169 = arith.divf %167, %168 : vector<8x1xf32>
    %cst_118 = arith.constant 9.99999996E-13 : f32
    %170 = vector.broadcast %cst_118 : f32 to vector<8x1xf32>
    %171 = arith.addf %169, %170 : vector<8x1xf32>
    %172 = math.rsqrt %171 : vector<8x1xf32>
    %173 = vector.broadcast %172 : vector<8x1xf32> to vector<8x32xf32>
    %174 = arith.mulf %164, %173 : vector<8x32xf32>
    %175 = vector.broadcast %156 : vector<1x32xf32> to vector<8x32xf32>
    %176 = arith.mulf %174, %175 : vector<8x32xf32>
    %177 = vector.broadcast %158 : vector<1x32xf32> to vector<8x32xf32>
    %178 = arith.addf %176, %177 : vector<8x32xf32>
    %c0_119 = arith.constant 0 : index
    %c0_120 = arith.constant 0 : index
    %179 = vector.load %arg26[%c0_119, %c0_120] : memref<8x32xf32, #tpu.memory_space<vmem>>, vector<8x32xf32>
    tpu.vector_store %arg26[%c0_119, %c0_120], %178 {strides = array<i32>} : memref<8x32xf32, #tpu.memory_space<vmem>>, vector<8x32xf32>,
    %c1_i32 = arith.constant 1 : i32
    %180 = arith.cmpi eq, %arg1, %c1_i32 : i32
    %181 = arith.extui %180 : i1 to i32
    %c0_i32_121 = arith.constant 0 : i32
    %182 = arith.cmpi ne, %181, %c0_i32_121 : i32
    scf.if %182 {
      %c0_122 = arith.constant 0 : index
      %c0_123 = arith.constant 0 : index
      %c0_124 = arith.constant 0 : index
      %183 = vector.load %arg24[%c0_122, %c0_123, %c0_124] : memref<1x8x32xf32, #tpu.memory_space<vmem>>, vector<1x8x32xf32>
      %184 = vector.shape_cast %183 : vector<1x8x32xf32> to vector<8x32xf32>
      %185 = vector.shape_cast %178 : vector<8x32xf32> to vector<1x8x32xf32>
      tpu.vector_store %arg24[%c0_122, %c0_123, %c0_124], %185 {strides = array<i32>} : memref<1x8x32xf32, #tpu.memory_space<vmem>>, vector<1x8x32xf32>,
      %186 = vector.extract_strided_slice %178 {offsets = [0, 0], sizes = [1, 32], strides = [1, 1]} : vector<8x32xf32> to vector<1x32xf32>
      %187 = arith.truncf %186 : vector<1x32xf32> to vector<1x32xbf16>
      %c0_125 = arith.constant 0 : index
      %c0_126 = arith.constant 0 : index
      %188 = vector.load %arg22[%c0_125, %c0_126] : memref<32x32xbf16, #tpu.memory_space<vmem>>, vector<32x32xbf16>
      %cst_127 = arith.constant dense<0.000000e+00> : vector<1x32xf32>
      %189 = tpu.matmul %187, %188, %cst_127 {dimension_numbers = #tpu.dot_dimension_numbers<[1], [0], [0], [1], [0, 0, 1, 1], [], []>} : vector<1x32xbf16>, vector<32x32xbf16>, vector<1x32xf32> -> vector<1x32xf32>
      %c0_128 = arith.constant 0 : index
      %c0_129 = arith.constant 0 : index
      %190 = vector.load %arg23[%c0_128, %c0_129] : memref<1x32xf32, #tpu.memory_space<vmem>>, vector<1x32xf32>
      %191 = arith.addf %189, %190 : vector<1x32xf32>
      %192 = math.tanh %191 : vector<1x32xf32>
      %c0_130 = arith.constant 0 : index
      %c0_131 = arith.constant 0 : index
      %c0_132 = arith.constant 0 : index
      %193 = vector.load %arg25[%c0_130, %c0_131, %c0_132] : memref<1x1x32xf32, #tpu.memory_space<vmem>>, vector<1x1x32xf32>
      %194 = vector.shape_cast %193 : vector<1x1x32xf32> to vector<1x32xf32>
      %195 = vector.shape_cast %192 : vector<1x32xf32> to vector<1x1x32xf32>
      tpu.vector_store %arg25[%c0_130, %c0_131, %c0_132], %195 {strides = array<i32>} : memref<1x1x32xf32, #tpu.memory_space<vmem>>, vector<1x1x32xf32>,
    } else {
    }
    return
  }
  func.func @transform_0(%arg0: i32, %arg1: i32) -> (i32, i32, i32) {
    %c0_i32 = arith.constant 0 : i32
    %c0_i32_0 = arith.constant 0 : i32
    %c0_i32_1 = arith.constant 0 : i32
    return %arg0, %c0_i32, %c0_i32_0 : i32, i32, i32
  }
  func.func @transform_1(%arg0: i32, %arg1: i32) -> (i32, i32, i32) {
    %c0_i32 = arith.constant 0 : i32
    %c0_i32_0 = arith.constant 0 : i32
    %c0_i32_1 = arith.constant 0 : i32
    return %arg0, %c0_i32, %c0_i32_0 : i32, i32, i32
  }
  func.func @transform_2(%arg0: i32, %arg1: i32) -> (i32, i32) {
    %c0_i32 = arith.constant 0 : i32
    %c0_i32_0 = arith.constant 0 : i32
    %c0_i32_1 = arith.constant 0 : i32
    return %c0_i32, %c0_i32_0 : i32, i32
  }
  func.func @transform_3(%arg0: i32, %arg1: i32) -> (i32, i32) {
    %c0_i32 = arith.constant 0 : i32
    %c0_i32_0 = arith.constant 0 : i32
    %c0_i32_1 = arith.constant 0 : i32
    return %c0_i32, %c0_i32_0 : i32, i32
  }
  func.func @transform_4(%arg0: i32, %arg1: i32) -> (i32, i32, i32, i32) {
    %c0_i32 = arith.constant 0 : i32
    %c0_i32_0 = arith.constant 0 : i32
    %c0_i32_1 = arith.constant 0 : i32
    %c0_i32_2 = arith.constant 0 : i32
    return %arg1, %c0_i32, %c0_i32_0, %c0_i32_1 : i32, i32, i32, i32
  }
  func.func @transform_5(%arg0: i32, %arg1: i32) -> (i32, i32, i32, i32) {
    %c0_i32 = arith.constant 0 : i32
    %c0_i32_0 = arith.constant 0 : i32
    %c0_i32_1 = arith.constant 0 : i32
    %c0_i32_2 = arith.constant 0 : i32
    return %arg1, %c0_i32, %c0_i32_0, %c0_i32_1 : i32, i32, i32, i32
  }
  func.func @transform_6(%arg0: i32, %arg1: i32) -> (i32, i32, i32, i32) {
    %c0_i32 = arith.constant 0 : i32
    %c0_i32_0 = arith.constant 0 : i32
    %c0_i32_1 = arith.constant 0 : i32
    %c0_i32_2 = arith.constant 0 : i32
    return %arg1, %c0_i32, %c0_i32_0, %c0_i32_1 : i32, i32, i32, i32
  }
  func.func @transform_7(%arg0: i32, %arg1: i32) -> (i32, i32, i32, i32) {
    %c0_i32 = arith.constant 0 : i32
    %c0_i32_0 = arith.constant 0 : i32
    %c0_i32_1 = arith.constant 0 : i32
    %c0_i32_2 = arith.constant 0 : i32
    return %arg1, %c0_i32, %c0_i32_0, %c0_i32_1 : i32, i32, i32, i32
  }
  func.func @transform_8(%arg0: i32, %arg1: i32) -> (i32, i32, i32, i32) {
    %c0_i32 = arith.constant 0 : i32
    %c0_i32_0 = arith.constant 0 : i32
    %c0_i32_1 = arith.constant 0 : i32
    %c0_i32_2 = arith.constant 0 : i32
    return %arg1, %c0_i32, %c0_i32_0, %c0_i32_1 : i32, i32, i32, i32
  }
  func.func @transform_9(%arg0: i32, %arg1: i32) -> (i32, i32, i32, i32) {
    %c0_i32 = arith.constant 0 : i32
    %c0_i32_0 = arith.constant 0 : i32
    %c0_i32_1 = arith.constant 0 : i32
    %c0_i32_2 = arith.constant 0 : i32
    return %arg1, %c0_i32, %c0_i32_0, %c0_i32_1 : i32, i32, i32, i32
  }
  func.func @transform_10(%arg0: i32, %arg1: i32) -> (i32, i32, i32, i32) {
    %c0_i32 = arith.constant 0 : i32
    %c0_i32_0 = arith.constant 0 : i32
    %c0_i32_1 = arith.constant 0 : i32
    %c0_i32_2 = arith.constant 0 : i32
    return %arg1, %c0_i32, %c0_i32_0, %c0_i32_1 : i32, i32, i32, i32
  }
  func.func @transform_11(%arg0: i32, %arg1: i32) -> (i32, i32, i32) {
    %c0_i32 = arith.constant 0 : i32
    %c0_i32_0 = arith.constant 0 : i32
    %c0_i32_1 = arith.constant 0 : i32
    return %arg1, %c0_i32, %c0_i32_0 : i32, i32, i32
  }
  func.func @transform_12(%arg0: i32, %arg1: i32) -> (i32, i32, i32) {
    %c0_i32 = arith.constant 0 : i32
    %c0_i32_0 = arith.constant 0 : i32
    %c0_i32_1 = arith.constant 0 : i32
    return %arg1, %c0_i32, %c0_i32_0 : i32, i32, i32
  }
  func.func @transform_13(%arg0: i32, %arg1: i32) -> (i32, i32, i32) {
    %c0_i32 = arith.constant 0 : i32
    %c0_i32_0 = arith.constant 0 : i32
    %c0_i32_1 = arith.constant 0 : i32
    return %arg1, %c0_i32, %c0_i32_0 : i32, i32, i32
  }
  func.func @transform_14(%arg0: i32, %arg1: i32) -> (i32, i32, i32) {
    %c0_i32 = arith.constant 0 : i32
    %c0_i32_0 = arith.constant 0 : i32
    %c0_i32_1 = arith.constant 0 : i32
    return %arg1, %c0_i32, %c0_i32_0 : i32, i32, i32
  }
  func.func @transform_15(%arg0: i32, %arg1: i32) -> (i32, i32, i32) {
    %c0_i32 = arith.constant 0 : i32
    %c0_i32_0 = arith.constant 0 : i32
    %c0_i32_1 = arith.constant 0 : i32
    return %arg1, %c0_i32, %c0_i32_0 : i32, i32, i32
  }
  func.func @transform_16(%arg0: i32, %arg1: i32) -> (i32, i32, i32) {
    %c0_i32 = arith.constant 0 : i32
    %c0_i32_0 = arith.constant 0 : i32
    %c0_i32_1 = arith.constant 0 : i32
    return %arg1, %c0_i32, %c0_i32_0 : i32, i32, i32
  }
  func.func @transform_17(%arg0: i32, %arg1: i32) -> (i32, i32, i32) {
    %c0_i32 = arith.constant 0 : i32
    %c0_i32_0 = arith.constant 0 : i32
    %c0_i32_1 = arith.constant 0 : i32
    return %arg1, %c0_i32, %c0_i32_0 : i32, i32, i32
  }
  func.func @transform_18(%arg0: i32, %arg1: i32) -> (i32, i32, i32) {
    %c0_i32 = arith.constant 0 : i32
    %c0_i32_0 = arith.constant 0 : i32
    %c0_i32_1 = arith.constant 0 : i32
    return %arg1, %c0_i32, %c0_i32_0 : i32, i32, i32
  }
  func.func @transform_19(%arg0: i32, %arg1: i32) -> (i32, i32, i32) {
    %c0_i32 = arith.constant 0 : i32
    %c0_i32_0 = arith.constant 0 : i32
    %c0_i32_1 = arith.constant 0 : i32
    return %arg1, %c0_i32, %c0_i32_0 : i32, i32, i32
  }
  func.func @transform_20(%arg0: i32, %arg1: i32) -> (i32, i32) {
    %c0_i32 = arith.constant 0 : i32
    %c0_i32_0 = arith.constant 0 : i32
    %c0_i32_1 = arith.constant 0 : i32
    return %c0_i32, %c0_i32_0 : i32, i32
  }
  func.func @transform_21(%arg0: i32, %arg1: i32) -> (i32, i32) {
    %c0_i32 = arith.constant 0 : i32
    %c0_i32_0 = arith.constant 0 : i32
    %c0_i32_1 = arith.constant 0 : i32
    return %c0_i32, %c0_i32_0 : i32, i32
  }
  func.func @transform_22(%arg0: i32, %arg1: i32) -> (i32, i32, i32) {
    %c0_i32 = arith.constant 0 : i32
    %c0_i32_0 = arith.constant 0 : i32
    %c0_i32_1 = arith.constant 0 : i32
    return %arg0, %c0_i32, %c0_i32_0 : i32, i32, i32
  }
  func.func @transform_23(%arg0: i32, %arg1: i32) -> (i32, i32, i32) {
    %c0_i32 = arith.constant 0 : i32
    %c0_i32_0 = arith.constant 0 : i32
    %c0_i32_1 = arith.constant 0 : i32
    return %arg0, %c0_i32, %c0_i32_0 : i32, i32, i32
  }
}

</mosaic_0001>

<bundles_post_ra>
// kernel: bert_forward.1
= control target key start
LH: loop header
LB: loop body
LE: loop exit
PB: predicated region body
PF: predicated region fallthrough
CT: control target
= control target key end

     0   :  { %s5700_s0 = inlined_call_operand.hbm [shape: f32[2,8,32], index: 0, kind: input, shape index: {}]   ;;  %s5701_s1 = inlined_call_operand.hbm [shape: f32[2,1,8], index: 1, kind: input, shape index: {}]   ;;  %s5702_s2 = inlined_call_operand.hbm [shape: f32[1,32], index: 2, kind: input, shape index: {}]   ;;  %s5703_s3 = inlined_call_operand.hbm [shape: f32[1,32], index: 3, kind: input, shape index: {}]   ;;  %s5704_s4 = inlined_call_operand.hbm [shape: bf16[2,2,32,16], index: 4, kind: input, shape index: {}]   ;;  %s5705_s5 = inlined_call_operand.hbm [shape: f32[2,2,1,16], index: 5, kind: input, shape index: {}]   ;;  %s5706_s6 = inlined_call_operand.hbm [shape: bf16[2,2,32,16], index: 6, kind: input, shape index: {}]   ;;  %s5707_s7 = inlined_call_operand.hbm [shape: f32[2,2,1,16], index: 7, kind: input, shape index: {}]   ;;  %s5708_s8 = inlined_call_operand.hbm [shape: bf16[2,2,32,16], index: 8, kind: input, shape index: {}]   ;;  %s5709_s9 = inlined_call_operand.hbm [shape: f32[2,2,1,16], index: 9, kind: input, shape index: {}]   ;;  %s5710_s10 = inlined_call_operand.hbm [shape: bf16[2,2,16,32], index: 10, kind: input, shape index: {}]   ;;  %s5711_s11 = inlined_call_operand.hbm [shape: f32[2,1,32], index: 11, kind: input, shape index: {}]   ;;  %s5712_s12 = inlined_call_operand.hbm [shape: f32[2,1,32], index: 12, kind: input, shape index: {}]   ;;  %s5713_s13 = inlined_call_operand.hbm [shape: f32[2,1,32], index: 13, kind: input, shape index: {}]   ;;  %s5714_s14 = inlined_call_operand.hbm [shape: bf16[2,32,64], index: 14, kind: input, shape index: {}]   ;;  %s5715_s15 = inlined_call_operand.hbm [shape: f32[2,1,64], index: 15, kind: input, shape index: {}]   ;;  %s5716_s16 = inlined_call_operand.hbm [shape: bf16[2,64,32], index: 16, kind: input, shape index: {}]   ;;  %s5717_s17 = inlined_call_operand.hbm [shape: f32[2,1,32], index: 17, kind: input, shape index: {}]   ;;  %s5718_s18 = inlined_call_operand.hbm [shape: f32[2,1,32], index: 18, kind: input, shape index: {}]   ;;  %s5719_s19 = inlined_call_operand.hbm [shape: f32[2,1,32], index: 19, kind: input, shape index: {}]   ;;  %s5720_s20 = inlined_call_operand.hbm [shape: bf16[32,32], index: 20, kind: input, shape index: {}]   ;;  %s5721_s21 = inlined_call_operand.hbm [shape: f32[1,32], index: 21, kind: input, shape index: {}]   ;;  %s5722_s22 = inlined_call_operand.hbm [shape: f32[2,8,32], index: 22, kind: output, shape index: {0}]   ;;  %s5723_s23 = inlined_call_operand.hbm [shape: f32[2,1,32], index: 23, kind: output, shape index: {1}]  }
   0x1   :  { %5788 = sst [smem:[#allocation76_spill]] %s5700_s0 }
   0x2   :  { %5789 = sst [smem:[#allocation77_spill]] %s5701_s1 }
   0x3   :  { %5790 = sst [smem:[#allocation78_spill]] %s5702_s2 }
   0x4   :  { %5791 = sst [smem:[#allocation79_spill]] %s5703_s3 }
   0x5   :  { %5792 = sst [smem:[#allocation80_spill]] %s5704_s4 }
   0x6   :  { %5793 = sst [smem:[#allocation81_spill]] %s5705_s5 }
   0x7   :  { %5794 = sst [smem:[#allocation82_spill]] %s5706_s6 }
   0x8   :  { %5795 = sst [smem:[#allocation83_spill]] %s5707_s7 }
   0x9   :  { %5796 = sst [smem:[#allocation84_spill]] %s5708_s8 }
   0xa   :  { %5797 = sst [smem:[#allocation85_spill]] %s5713_s13 }
   0xb   :  { %5798 = sst [smem:[#allocation86_spill]] %s5714_s14 }
   0xc   :  { %5799 = sst [smem:[#allocation87_spill]] %s5715_s15 }
   0xd   :  { %5800 = sst [smem:[#allocation88_spill]] %s5716_s16 }
   0xe   :  { %5801 = sst [smem:[#allocation89_spill]] %s5717_s17 }
   0xf   :  { %5802 = sst [smem:[#allocation90_spill]] %s5718_s18 }
  0x10   :  { %5803 = sst [smem:[#allocation91_spill]] %s5719_s19 }
  0x11   :  { %5804 = sst [smem:[#allocation92_spill]] %s5720_s20 }
  0x12   :  { %5805 = sst [smem:[#allocation93_spill]] %s5721_s21 }
  0x13   :  { %5806 = sst [smem:[#allocation94_spill]] %s5722_s22 }
  0x14   :  { %5807 = sst [smem:[#allocation95_spill]] %s5723_s23 }
  0x15   :  { %29 = vsyncpa [#allocation4], 0 }
  0x16   :  { %31 = vsyncpa [#allocation4 + $0x1], 0 }
  0x17   :  { %32 = vsyncpa [#allocation7], 0 }
  0x18   :  { %34 = vsyncpa [#allocation7 + $0x1], 0 }
  0x19   :  { %35 = vsyncpa [#allocation10], 0 }
  0x1a   :  { %36 = vsyncpa [#allocation29], 0 }
  0x1b   :  { %37 = vsyncpa [#allocation5], 0 }
  0x1c   :  { %39 = vsyncpa [#allocation5 + $0x1], 0 }
  0x1d   :  { %40 = vsyncpa [#allocation32], 0 }
  0x1e   :  { %42 = vsyncpa [#allocation32 + $0x1], 0  ;;  %s4474_s4 = smov 0   ;;  %s4476_s30 = smov 0  }
  0x1f   :  { %s4478_s24 = smov 0   ;;  %s4480_s25 = smov 0  }
  0x20   :  { %s4482_s5 = smov 0   ;;  %s4484_s1 = smov 0  }
  0x21   :  { %s4486_s26 = smov 0   ;;  %s4488_s2 = smov 0  }
  0x22   :  { %s4490_s6 = smov 0   ;;  %s4492_s27 = smov 0  }
  0x23   :  { %s4494_s7 = smov 0  }
  0x24 LB: > { %5808 = sst [smem:[#allocation57_spill]] %s4282_s30  ;;  %s4530_s28 = sadd.s32 4294967295, %s4318_s7   ;;  %s4318_s7 = sphi %s4494_s7, %s48_s7   ;;  %s4314_s27 = sphi %s4492_s27, %s5919_s27   ;;  %s4310_s6 = sphi %s4490_s6, %s5921_s6   ;;  %s4306_s2 = sphi %s4488_s2, %s5917_s2   ;;  %s4302_s26 = sphi %s4486_s26, %s5920_s26   ;;  %s4298_s1 = sphi %s4484_s1, %s5916_s1   ;;  %s4294_s5 = sphi %s4482_s5, %s5915_s5   ;;  %s4290_s25 = sphi %s4480_s25, %s5914_s25   ;;  %s4286_s24 = sphi %s4478_s24, %s5913_s24   ;;  %s4282_s30 = sphi %s4476_s30, %s5912_s30   ;;  %s4278_s4 = sphi %s4474_s4, %s5911_s4  }
  0x25   : > { %5809 = sst [smem:[#allocation58_spill]] %s4286_s24  ;;  %s2938_s29 = sadd.s32 4294967294, %s4318_s7  }
  0x26   : > { %5810 = sst [smem:[#allocation59_spill]] %s4290_s25  ;;  %s57_s3 = sadd.s32 1, %s4310_s6 }
  0x27   : > { %5811 = sst [smem:[#allocation60_spill]] %s4294_s5  ;;  %s60_s0 = sadd.s32 1, %s4314_s27 }
  0x28   : > { %5812 = sst [smem:[#allocation61_spill]] %s4298_s1  ;;  %p58_p0 = scmp.ge.s32.totalorder %s57_s3, 2 }
  0x29   : > { %5813 = sst [smem:[#allocation62_spill]] %s4302_s26  ;;  %s67_s23 = sadd.s32 1, %s4298_s1 }
  0x2a   : > { %5814 = sst [smem:[#allocation63_spill]] %s4306_s2  ;;  %p5742_p1 = scmp.ne.s32.totalorder %s4298_s1, %s4294_s5 }
  0x2b   : > { %5815 = sst [smem:[#allocation64_spill]] %s4314_s27  ;;  %p75_p2 = scmp.eq.s32.totalorder %s4318_s7, 0 }
  0x2c   : > { %5816 = sst [smem:[#allocation65_spill]] %s4318_s7  ;;  %s5923_s3 = smov (%p58_p0, %s57_s3), 0 }
  0x2d   : > { %5817 = sst [smem:[#allocation66_spill]] %s4530_s28  ;;  %s5925_s0 = smov (!%p58_p0, %s60_s0), %s4314_s27 }
  0x2e   : > { %5818 = sst [smem:[#allocation67_spill]] %s5923_s3  ;;  %p4547_p3 = por %p75_p2, %p5742_p1 }
  0x2f   : > { %p5741_p4 = scmp.ne.s32.totalorder %s4294_s5, %s4290_s25  ;;  %p62_p5 = scmp.ge.s32.totalorder %s5925_s0, 2 }
  0x30   : > { %s5819_s22 = scalar_select %p4547_p3, 1, 0 }
  0x31   : > { %p5758_p6 = scmp.eq.s32.totalorder %s4530_s28, 0  ;;  %s158_s2 = ssub.s32 %s4310_s6, %s5923_s3 }
  0x32   : > { %s161_s26 = sadd.s32 1, %s4286_s24  ;;  %s5927_s0 = smov (%p62_p5, %s5925_s0), 0 }
  0x33   : > { %5820 = sst [smem:[#allocation68_spill]] %s5927_s0  ;;  %p4564_p7 = por %p5758_p6, %p5741_p4 }
  0x34   : > { %p159_p8 = scmp.eq.s32.totalorder %s158_s2, 0  ;;  %s64_s18 = ssub.s32 %s4314_s27, %s5927_s0 }
  0x35   : > { %s5821_s19 = scalar_select %p4564_p7, 1, 0 }
  0x36   : > { %p168_p9 = scmp.ne.s32.totalorder %s4286_s24, %s4282_s30  ;;  %p65_p10 = scmp.eq.s32.totalorder %s64_s18, 0 }
  0x37   : > { %5822 = sst [smem:[#allocation69_spill]] %s5821_s19  ;;  %p174_p11 = scmp.ne.s32.totalorder %s4282_s30, %s4278_s4 }
  0x38   : > { %s4575_s3 = scalar_select %p159_p8, %s4286_s24, %s161_s26  }
  0x39   : > { %s4578_s17 = scalar_select %p65_p10, %s4298_s1, %s67_s23  }
  0x3a   : > { %5823 = sst [smem:[#allocation70_spill]] %s4575_s3  ;;  %p4582_p12 = por %p168_p9, %p75_p2 }
  0x3b   : > { %5824 = sst [smem:[#allocation71_spill]] %s4578_s17  ;;  %p4588_p13 = por %p174_p11, %p5758_p6 }
  0x3c   : > { %s5825_s16 = scalar_select %p4582_p12, 1, 0 }
  0x3d   : > { %s5826_s15 = scalar_select %p4588_p13, 1, 0 }
  0x3e   : > { %p630_p0 = scmp.eq.s32.totalorder %s4530_s28, 3  ;;  %p636_p5 = scmp.eq.s32.totalorder %s2938_s29, 3 }
  0x3f   : > { %5827 = sst [smem:[#allocation72_spill]] %s5826_s15  ;;  %p2939_p4 = scmp.ge.s32.totalorder %s4318_s7, 1 }
  0x40   : > { %p669_p1 = scmp.lt.s32.totalorder %s4318_s7, 5  ;;  %p5828_p7 = scmp.ne.s32.totalorder %s4298_s1, %s4294_s5 }
  0x41   : > { %p5831_p8 = scmp.ne.s32.totalorder %s4294_s5, %s4290_s25  ;;  %s4320_s26 = smov [#allocation9]  }
  0x42   : > { %p4598_p3 = por %p630_p0, %p5828_p7  ;;  %p4609_p2 = pnand %p2939_p4, %p669_p1 }
  0x43   : > { %p4605_p10 = por %p636_p5, %p5831_p8  ;;  %s693_s2 = sshll.u32 %s4320_s26, 4  ;;  %s694_s2 = int_to_ptr.vmem [resolvable:$true] %s693_s2 }
  0x44   : > { %s5829_s18 = scalar_select %p4598_p3, 1, 0 }
  0x45   : > { %s5832_s23 = scalar_select %p4605_p10, 1, 0 }
  0x46   : > { %5830 = sst [smem:[#allocation73_spill]] %s5829_s18  ;;  %p3293_p9 = pneg %p4609_p2 }
  0x47   : > { %5833 = sst [smem:[#allocation74_spill]] %s5832_s23  ;;  %s4321_s0 = smov [#allocation8]  }
  0x48   : > { %s5834_s4 = scalar_select %p4609_p2, 1, 0 }
  0x49   : > { %p4617_p7 = pnand %p3293_p9, %p5758_p6  ;;  %s682_s17 = sshll.u32 %s4321_s0, 4  ;;  %s683_s17 = int_to_ptr.vmem [resolvable:$true] %s682_s17 }
  0x4a   : > { %5835 = sst [smem:[#allocation75_spill]] %s5834_s4  ;;  %s5837_s25 = sld [smem:[#allocation79_spill]] }
  0x4b   : > { %p4629_p4 = pneg %p4617_p7 }
  0x50   : > { %s5838_s18 = smov %s5837_s25  ;;  %s3464_s15 = scalar_lea.hbm %s5837_s25, 16 }
  0x51   : > { %p3465_p1 = scmp.ne.s32.totalorder %s5838_s18, %s3464_s15  ;;  %p3471_p5 = scmp.lt.u32.totalorder %s3464_s15, %s5838_s18 }
  0x53   : > { %p3467_p11 = pnand %p4629_p4, %p3465_p1 }
  0x55   : > { %p3468_p0 = pneg %p3467_p11 }
  0x57   : > { %p3473_p8 = pnand %p3471_p5, %p3468_p0 }
  0x59   : > { %3476 = shalt.err (!%p3473_p8)
}
  0x5a   : > { %s3477_s25 = scalar_lea.vmem %s694_s2, 16  ;;  %s3484_s19 = scalar_lea.vmem %s694_s2, 32 }
  0x5b   : > { %p3478_p9 = scmp.ne.s32.totalorder %s694_s2, %s3477_s25  ;;  %p3485_p3 = scmp.lt.s32.totalorder %s694_s2, %s694_s2 }
  0x5c   : > { %p3486_p13 = scmp.lt.s32.totalorder %s3484_s19, %s3477_s25 }
  0x5d   : > { %p3480_p6 = pnand %p3478_p9, %p4629_p4 }
  0x5e   : > { %p3487_p2 = por %p3486_p13, %p3485_p3 }
  0x5f   : > { %p3481_p10 = pneg %p3480_p6 }
  0x61   : > { %p3488_p12 = pnand %p3487_p2, %p3481_p10 }
  0x63   : > { %3491 = shalt.err (!%p3488_p12)
}
  0x64   : > { %3299 = dma.hbm_to_vmem [thread:$0]  (!%p4617_p7), %s5838_s18, 16, %s694_s2, [#allocation10]  }
  0x65   : > { %s5840_s28 = sld [smem:[#allocation78_spill]] }
  0x6b   : > { %s3492_s0 = scalar_lea.hbm %s5840_s28, 16 }
  0x6c   : > { %p3493_p6 = scmp.ne.s32.totalorder %s5840_s28, %s3492_s0  ;;  %p3499_p12 = scmp.lt.u32.totalorder %s3492_s0, %s5840_s28 }
  0x6e   : > { %p3495_p3 = pnand %p3493_p6, %p4629_p4 }
  0x70   : > { %p3496_p13 = pneg %p3495_p3 }
  0x72   : > { %p3501_p10 = pnand %p3499_p12, %p3496_p13 }
  0x74   : > { %3504 = shalt.err (!%p3501_p10)
}
  0x75   : > { %s3505_s30 = scalar_lea.vmem %s683_s17, 16  ;;  %s3512_s2 = scalar_lea.vmem %s683_s17, 32 }
  0x76   : > { %p3506_p2 = scmp.ne.s32.totalorder %s683_s17, %s3505_s30  ;;  %p3513_p0 = scmp.lt.s32.totalorder %s683_s17, %s683_s17 }
  0x77   : > { %p3514_p5 = scmp.lt.s32.totalorder %s3512_s2, %s3505_s30 }
  0x78   : > { %p3508_p1 = pnand %p3506_p2, %p4629_p4 }
  0x79   : > { %p3515_p8 = por %p3514_p5, %p3513_p0 }
  0x7a   : > { %p3509_p11 = pneg %p3508_p1 }
  0x7c   : > { %p3516_p9 = pnand %p3515_p8, %p3509_p11 }
  0x7e   : > { %3519 = shalt.err (!%p3516_p9)
}
  0x7f   : > { %3296 = dma.hbm_to_vmem [thread:$0]  (!%p4617_p7), %s5840_s28, 16, %s683_s17, [#allocation7]  }
  0x80   : > { %s4322_s15 = smov [#allocation27]   ;;  %s5841_s20 = sld [smem:[#allocation92_spill]] }
  0x81   : > { %s703_s5 = sshll.u32 %s4322_s15, 4  ;;  %s704_s5 = int_to_ptr.vmem [resolvable:$true] %s703_s5 }
  0x86   : > { %s3520_s25 = scalar_lea.hbm %s5841_s20, 256 }
  0x87   : > { %p3521_p6 = scmp.ne.s32.totalorder %s5841_s20, %s3520_s25  ;;  %p3527_p12 = scmp.lt.u32.totalorder %s3520_s25, %s5841_s20 }
  0x89   : > { %p3523_p3 = pnand %p3521_p6, %p4629_p4 }
  0x8b   : > { %p3524_p13 = pneg %p3523_p3 }
  0x8d   : > { %p3529_p10 = pnand %p3527_p12, %p3524_p13 }
  0x8f   : > { %3532 = shalt.err (!%p3529_p10)
}
  0x90   : > { %s3533_s17 = scalar_lea.vmem %s704_s5, 256  ;;  %p3541_p0 = scmp.lt.s32.totalorder %s704_s5, %s704_s5 }
  0x91   : > { %p3534_p2 = scmp.ne.s32.totalorder %s704_s5, %s3533_s17  ;;  %p3542_p5 = scmp.lt.s32.totalorder %s3533_s17, %s3533_s17 }
  0x93   : > { %p3536_p1 = pnand %p3534_p2, %p4629_p4  ;;  %p3543_p8 = por %p3542_p5, %p3541_p0 }
  0x95   : > { %p3537_p11 = pneg %p3536_p1 }
  0x97   : > { %p3544_p9 = pnand %p3543_p8, %p3537_p11 }
  0x99   : > { %3547 = shalt.err (!%p3544_p9)
}
  0x9a   : > { %s4323_s18 = smov 64   ;;  %s4324_s4 = smov 4  }
  0x9b   : > { %3302 = dma.hbm_to_vmem [thread:$0]  (!%p4617_p7), %s5841_s20, 256, %s704_s5, [#allocation10], %s4323_s18, %s4323_s18, %s4324_s4  }
  0x9c   : > { %s4325_s0 = smov [#allocation28]   ;;  %s5842_s21 = sld [smem:[#allocation93_spill]] }
  0x9d   : > { %s717_s23 = sshll.u32 %s4325_s0, 4  ;;  %s718_s23 = int_to_ptr.vmem [resolvable:$true] %s717_s23 }
  0xa2   : > { %s3548_s30 = scalar_lea.hbm %s5842_s21, 16 }
  0xa3   : > { %p3549_p6 = scmp.ne.s32.totalorder %s5842_s21, %s3548_s30  ;;  %p3555_p12 = scmp.lt.u32.totalorder %s3548_s30, %s5842_s21 }
  0xa5   : > { %p3551_p3 = pnand %p3549_p6, %p4629_p4 }
  0xa7   : > { %p3552_p13 = pneg %p3551_p3 }
  0xa9   : > { %p3557_p10 = pnand %p3555_p12, %p3552_p13 }
  0xab   : > { %3560 = shalt.err (!%p3557_p10)
}
  0xac   : > { %s3561_s5 = scalar_lea.vmem %s718_s23, 16  ;;  %s3568_s18 = scalar_lea.vmem %s718_s23, 32 }
  0xad   : > { %p3562_p2 = scmp.ne.s32.totalorder %s718_s23, %s3561_s5  ;;  %p3569_p0 = scmp.lt.s32.totalorder %s718_s23, %s718_s23 }
  0xae   : > { %p3570_p5 = scmp.lt.s32.totalorder %s3568_s18, %s3561_s5 }
  0xaf   : > { %p3564_p1 = pnand %p3562_p2, %p4629_p4 }
  0xb0   : > { %p3571_p8 = por %p3570_p5, %p3569_p0 }
  0xb1   : > { %p3565_p11 = pneg %p3564_p1 }
  0xb3   : > { %p3572_p9 = pnand %p3571_p8, %p3565_p11 }
  0xb5   : > { %3575 = shalt.err (!%p3572_p9)
}
  0xb6   : > { %3305 = dma.hbm_to_vmem [thread:$0]  (!%p4617_p7), %s5842_s21, 16, %s718_s23, [#allocation29]  }
  0xb7   : > { %p2944_p6 = scmp.ge.s32.totalorder %s4318_s7, 4 }
  0xb8   : > { %s728_s14 = sand.u32 (!%p2944_p6), 1, %s4318_s7   ;;  %s730_s26 = sand.u32 (!%p2944_p6), 1, %s4298_s1  }
  0xb9   : > { %724 = sbr.rel (%p2944_p6) target bundleno = 674 (0x2a2), region = 32  ;;  %s2945_s28 = sshll.u32 (!%p2944_p6), %s730_s26, 3 }
  0xba   : > { %s2946_s15 = sshll.u32 (!%p2944_p6), %s4314_s27, 7  ;;  %s5843_s25 = sld [smem:[#allocation76_spill]] (!%p2944_p6) }
  0xbb   : > { %s732_s23 = scalar_lea.vmem (!%p2944_p6), [#allocation3], %s2945_s28  ;;  %s4712_s17 = scalar_lea.sflag (!%p2944_p6), [#allocation4], %s728_s14 }
  0xbc   : > { %s739_s2 = sshll.u32 (!%p2944_p6), %s732_s23, 4  ;;  %p5845_p4 = scmp.ne.s32.totalorder (!%p2944_p6), %s5819_s22, 0  ;;  %s740_s2 = int_to_ptr.vmem [resolvable:$true] %s739_s2 }
  0xc0   : > { %s5844_s19 = smov %s5843_s25  ;;  %s4708_s30 = scalar_lea.hbm %s5843_s25, %s2946_s15 }
  0xc1   : > { %s3576_s5 = scalar_lea.hbm %s4708_s30, 128  ;;  %s3580_s3 = scalar_lea.hbm %s5844_s19, 256 }
  0xc2   : > { %p3577_p7 = scmp.ne.s32.totalorder %s4708_s30, %s3576_s5  ;;  %p3581_p12 = scmp.lt.u32.totalorder %s4708_s30, %s5844_s19 }
  0xc3   : > { %p3582_p10 = scmp.lt.u32.totalorder %s3580_s3, %s3576_s5  ;;  %p3584_p1 = scmp.lt.u32.totalorder %s3576_s5, %s4708_s30 }
  0xc4   : > { %p3578_p3 = pnand %p3577_p7, %p5845_p4 }
  0xc5   : > { %p3583_p2 = por %p3582_p10, %p3581_p12 }
  0xc6   : > { %p3579_p13 = pneg %p3578_p3 }
  0xc7   : > { %p3585_p11 = por %p3584_p1, %p3583_p2 }
  0xc9   : > { %p3586_p0 = pnand %p3585_p11, %p3579_p13 }
  0xcb   : > { %3589 = shalt.err (!%p3586_p0)
}
  0xcc   : > { %s3590_s28 = scalar_lea.vmem %s740_s2, 128  ;;  %s4326_s29 = smov [#allocation3]  }
  0xcd   : > { %p3591_p5 = scmp.ne.s32.totalorder %s740_s2, %s3590_s28  ;;  %s3594_s25 = sshll.u32 %s4326_s29, 4  ;;  %s3595_s25 = int_to_ptr.vmem [resolvable:$false] %s3594_s25 }
  0xce   : > { %s3596_s23 = scalar_lea.vmem %s3595_s25, 256  ;;  %p3597_p6 = scmp.lt.s32.totalorder %s740_s2, %s3595_s25 }
  0xcf   : > { %p3592_p8 = pnand %p3591_p5, %p5845_p4  ;;  %p3598_p7 = scmp.lt.s32.totalorder %s3596_s23, %s3590_s28 }
  0xd1   : > { %p3593_p9 = pneg %p3592_p8  ;;  %p3599_p3 = por %p3598_p7, %p3597_p6 }
  0xd3   : > { %p3600_p10 = pnand %p3599_p3, %p3593_p9 }
  0xd5   : > { %3603 = shalt.err (!%p3600_p10)
}
  0xd6   : > { %3245 = dma.hbm_to_vmem [thread:$0]  (%p5845_p4), %s4708_s30, 128, %s740_s2, %s4712_s17  }
  0xd7   : > { %s2947_s5 = sshll.u32 %s4314_s27, 4  ;;  %s5846_s3 = sld [smem:[#allocation77_spill]] }
  0xd8   : > { %s749_s0 = scalar_lea.vmem [#allocation6], %s730_s26  ;;  %s4743_s29 = sand.u32 1, %s4286_s24  }
  0xd9   : > { %s756_s28 = sshll.u32 %s749_s0, 4  ;;  %s4747_s25 = scalar_lea.sflag [#allocation7], %s728_s14  ;;  %s4740_s28 = int_to_ptr.vmem [resolvable:$true] %s756_s28 }
  0xdd   : > { %s4736_s15 = scalar_lea.hbm %s5846_s3, %s2947_s5  ;;  %s3608_s5 = scalar_lea.hbm %s5846_s3, 32 }
  0xde   : > { %s3604_s30 = scalar_lea.hbm %s4736_s15, 16  ;;  %p3609_p1 = scmp.lt.u32.totalorder %s4736_s15, %s5846_s3 }
  0xdf   : > { %p3605_p13 = scmp.ne.s32.totalorder %s4736_s15, %s3604_s30  ;;  %p3610_p11 = scmp.lt.u32.totalorder %s3608_s5, %s3604_s30 }
  0xe0   : > { %p3612_p5 = scmp.lt.u32.totalorder %s3604_s30, %s4736_s15 }
  0xe1   : > { %p3606_p12 = pnand %p3605_p13, %p5845_p4  ;;  %p3611_p0 = por %p3610_p11, %p3609_p1 }
  0xe3   : > { %p3607_p2 = pneg %p3606_p12  ;;  %p3613_p8 = por %p3612_p5, %p3611_p0 }
  0xe5   : > { %p3614_p9 = pnand %p3613_p8, %p3607_p2 }
  0xe7   : > { %3617 = shalt.err (!%p3614_p9)
}
  0xe8   : > { %s3618_s14 = scalar_lea.vmem %s4740_s28, 16  ;;  %s4327_s26 = smov [#allocation6]  }
  0xe9   : > { %p3619_p6 = scmp.ne.s32.totalorder %s4740_s28, %s3618_s14  ;;  %s3622_s0 = sshll.u32 %s4327_s26, 4  ;;  %s3623_s0 = int_to_ptr.vmem [resolvable:$false] %s3622_s0 }
  0xea   : > { %s3624_s2 = scalar_lea.vmem %s3623_s0, 32  ;;  %p3625_p10 = scmp.lt.s32.totalorder %s4740_s28, %s3623_s0 }
  0xeb   : > { %p3620_p7 = pnand %p3619_p6, %p5845_p4  ;;  %p3626_p13 = scmp.lt.s32.totalorder %s3624_s2, %s3618_s14 }
  0xed   : > { %p3621_p3 = pneg %p3620_p7  ;;  %p3627_p12 = por %p3626_p13, %p3625_p10 }
  0xef   : > { %p3628_p1 = pnand %p3627_p12, %p3621_p3 }
  0xf1   : > { %3631 = shalt.err (!%p3628_p1)
}
  0xf2   : > { %3246 = dma.hbm_to_vmem [thread:$0]  (%p5845_p4), %s4736_s15, 16, %s4740_s28, %s4747_s25  }
  0xf3   : > { %s4772_s30 = sshll.u32 %s4743_s29, 5  ;;  %s4775_s23 = sshll.u32 %s4310_s6, 9 }
  0xf4   : > { %s5847_s4 = sld [smem:[#allocation80_spill]]  ;;  %s767_s22 = scalar_lea.vmem [#allocation11], %s4772_s30 }
  0xf5   : > { %s774_s0 = sshll.u32 %s767_s22, 4  ;;  %p5849_p2 = scmp.ne.s32.totalorder %s5825_s16, 0  ;;  %s4784_s0 = int_to_ptr.vmem [resolvable:$true] %s774_s0 }
  0xfa   : > { %s5848_s14 = smov %s5847_s4  ;;  %s4781_s26 = scalar_lea.hbm %s5847_s4, %s4775_s23 }
  0xfb   : > { %s3632_s15 = scalar_lea.hbm %s4781_s26, 512  ;;  %s3636_s3 = scalar_lea.hbm %s5848_s14, 1024 }
  0xfc   : > { %p3633_p4 = scmp.ne.s32.totalorder %s4781_s26, %s3632_s15  ;;  %p3637_p5 = scmp.lt.u32.totalorder %s4781_s26, %s5848_s14 }
  0xfd   : > { %p3638_p8 = scmp.lt.u32.totalorder %s3636_s3, %s3632_s15  ;;  %p3640_p6 = scmp.lt.u32.totalorder %s3632_s15, %s4781_s26 }
  0xfe   : > { %p3634_p11 = pnand %p3633_p4, %p5849_p2 }
  0xff   : > { %p3639_p9 = por %p3638_p8, %p3637_p5 }
 0x100   : > { %p3635_p0 = pneg %p3634_p11 }
 0x101   : > { %p3641_p7 = por %p3640_p6, %p3639_p9 }
 0x103   : > { %p3642_p3 = pnand %p3641_p7, %p3635_p0 }
 0x105   : > { %3645 = shalt.err (!%p3642_p3)
}
 0x106   : > { %s3646_s4 = scalar_lea.vmem %s4784_s0, 512  ;;  %s4328_s22 = smov [#allocation11]  }
 0x107   : > { %p3647_p10 = scmp.ne.s32.totalorder %s4784_s0, %s3646_s4  ;;  %s3650_s28 = sshll.u32 %s4328_s22, 4  ;;  %s3651_s28 = int_to_ptr.vmem [resolvable:$false] %s3650_s28 }
 0x108   : > { %s3652_s2 = scalar_lea.vmem %s3651_s28, 1024  ;;  %p3653_p1 = scmp.lt.s32.totalorder %s4784_s0, %s3651_s28 }
 0x109   : > { %p3648_p13 = pnand %p3647_p10, %p5849_p2  ;;  %p3654_p4 = scmp.lt.s32.totalorder %s3652_s2, %s3646_s4 }
 0x10b   : > { %p3649_p12 = pneg %p3648_p13  ;;  %p3655_p11 = por %p3654_p4, %p3653_p1 }
 0x10d   : > { %p3656_p5 = pnand %p3655_p11, %p3649_p12 }
 0x10f   : > { %3659 = shalt.err (!%p3656_p5)
}
 0x110   : > { %s5770_s3 = smov 64   ;;  %s5772_s15 = smov 4  }
 0x111   : > { %3247 = dma.hbm_to_vmem [thread:$0]  (%p5849_p2), %s4781_s26, 512, %s4784_s0, %s4712_s17, %s5770_s3, %s5770_s3, %s5772_s15  }
 0x112   : > { %s4812_s5 = sshll.u32 %s4743_s29, 1  ;;  %s4815_s18 = sshll.u32 %s4310_s6, 5 }
 0x113   : > { %s5850_s28 = sld [smem:[#allocation81_spill]]  ;;  %s788_s14 = scalar_lea.vmem [#allocation12], %s4812_s5 }
 0x114   : > { %s795_s19 = sshll.u32 %s788_s14, 4  ;;  %s4824_s19 = int_to_ptr.vmem [resolvable:$true] %s795_s19 }
 0x119   : > { %s4821_s2 = scalar_lea.hbm %s5850_s28, %s4815_s18  ;;  %s3664_s15 = scalar_lea.hbm %s5850_s28, 64 }
 0x11a   : > { %s3660_s26 = scalar_lea.hbm %s4821_s2, 32  ;;  %p3665_p6 = scmp.lt.u32.totalorder %s4821_s2, %s5850_s28 }
 0x11b   : > { %p3661_p0 = scmp.ne.s32.totalorder %s4821_s2, %s3660_s26  ;;  %p3666_p7 = scmp.lt.u32.totalorder %s3664_s15, %s3660_s26 }
 0x11c   : > { %p3668_p10 = scmp.lt.u32.totalorder %s3660_s26, %s4821_s2 }
 0x11d   : > { %p3662_p8 = pnand %p3661_p0, %p5849_p2  ;;  %p3667_p3 = por %p3666_p7, %p3665_p6 }
 0x11f   : > { %p3663_p9 = pneg %p3662_p8  ;;  %p3669_p13 = por %p3668_p10, %p3667_p3 }
 0x121   : > { %p3670_p12 = pnand %p3669_p13, %p3663_p9 }
 0x123   : > { %3673 = shalt.err (!%p3670_p12)
}
 0x124   : > { %s3674_s14 = scalar_lea.vmem %s4824_s19, 32  ;;  %s4331_s3 = smov [#allocation12]  }
 0x125   : > { %p3675_p1 = scmp.ne.s32.totalorder %s4824_s19, %s3674_s14  ;;  %s3678_s0 = sshll.u32 %s4331_s3, 4  ;;  %s3679_s0 = int_to_ptr.vmem [resolvable:$false] %s3678_s0 }
 0x126   : > { %s3680_s4 = scalar_lea.vmem %s3679_s0, 64  ;;  %p3681_p5 = scmp.lt.s32.totalorder %s4824_s19, %s3679_s0 }
 0x127   : > { %p3676_p4 = pnand %p3675_p1, %p5849_p2  ;;  %p3682_p0 = scmp.lt.s32.totalorder %s3680_s4, %s3674_s14 }
 0x129   : > { %p3677_p11 = pneg %p3676_p4  ;;  %p3683_p8 = por %p3682_p0, %p3681_p5 }
 0x12b   : > { %p3684_p6 = pnand %p3683_p8, %p3677_p11 }
 0x12d   : > { %3687 = shalt.err (!%p3684_p6)
}
 0x12e   : > { %s5779_s15 = smov 16   ;;  %s5781_s26 = smov 1  }
 0x12f   : > { %3248 = dma.hbm_to_vmem [thread:$0]  (%p5849_p2), %s4821_s2, 32, %s4824_s19, %s4747_s25, %s5779_s15, %s5779_s15, %s5781_s26  }
 0x130   : > { %s5851_s3 = sld [smem:[#allocation82_spill]]  ;;  %s809_s4 = scalar_lea.vmem [#allocation13], %s4772_s30 }
 0x131   : > { %s816_s20 = sshll.u32 %s809_s4, 4  ;;  %s5852_s27 = sld [smem:[#allocation83_spill]]  ;;  %s4858_s20 = int_to_ptr.vmem [resolvable:$true] %s816_s20 }
 0x136   : > { %s4855_s0 = scalar_lea.hbm %s5851_s3, %s4775_s23  ;;  %s3692_s22 = scalar_lea.hbm %s5851_s3, 1024 }
 0x137   : > { %s5853_s13 = smov %s5852_s27  ;;  %s4864_s1 = scalar_lea.hbm %s5852_s27, %s4815_s18 }
 0x138   : > { %s3688_s24 = scalar_lea.hbm %s4855_s0, 512  ;;  %p3693_p10 = scmp.lt.u32.totalorder %s4855_s0, %s5851_s3 }
 0x139   : > { %p3689_p9 = scmp.ne.s32.totalorder %s4855_s0, %s3688_s24  ;;  %p3694_p13 = scmp.lt.u32.totalorder %s3692_s22, %s3688_s24 }
 0x13a   : > { %p3696_p1 = scmp.lt.u32.totalorder %s3688_s24, %s4855_s0 }
 0x13b   : > { %p3690_p7 = pnand %p3689_p9, %p5849_p2  ;;  %p3695_p12 = por %p3694_p13, %p3693_p10 }
 0x13d   : > { %p3691_p3 = pneg %p3690_p7  ;;  %p3697_p4 = por %p3696_p1, %p3695_p12 }
 0x13f   : > { %p3698_p11 = pnand %p3697_p4, %p3691_p3 }
 0x141   : > { %3701 = shalt.err (!%p3698_p11)
}
 0x142   : > { %s3702_s21 = scalar_lea.vmem %s4858_s20, 512  ;;  %s4334_s27 = smov [#allocation13]  }
 0x143   : > { %p3703_p5 = scmp.ne.s32.totalorder %s4858_s20, %s3702_s21  ;;  %s3706_s28 = sshll.u32 %s4334_s27, 4  ;;  %s3707_s28 = int_to_ptr.vmem [resolvable:$false] %s3706_s28 }
 0x144   : > { %s3708_s15 = scalar_lea.vmem %s3707_s28, 1024  ;;  %p3709_p6 = scmp.lt.s32.totalorder %s4858_s20, %s3707_s28 }
 0x145   : > { %p3704_p0 = pnand %p3703_p5, %p5849_p2  ;;  %p3710_p9 = scmp.lt.s32.totalorder %s3708_s15, %s3702_s21 }
 0x147   : > { %p3705_p8 = pneg %p3704_p0  ;;  %p3711_p7 = por %p3710_p9, %p3709_p6 }
 0x149   : > { %p3712_p10 = pnand %p3711_p7, %p3705_p8 }
 0x14b   : > { %3715 = shalt.err (!%p3712_p10)
}
 0x14c   : > { %s5854_s24 = smov 4   ;;  %s5855_s4 = smov 64  }
 0x14d   : > { %3249 = dma.hbm_to_vmem [thread:$0]  (%p5849_p2), %s4855_s0, 512, %s4858_s20, %s4712_s17, %s5855_s4, %s5855_s4, %s5854_s24  }
 0x14e   : > { %s830_s19 = scalar_lea.vmem [#allocation14], %s4812_s5  ;;  %s5856_s8 = sld [smem:[#allocation84_spill]] }
 0x14f   : > { %s837_s2 = sshll.u32 %s830_s19, 4  ;;  %s3716_s27 = scalar_lea.hbm %s4864_s1, 32  ;;  %s4892_s2 = int_to_ptr.vmem [resolvable:$true] %s837_s2 }
 0x150   : > { %p3717_p3 = scmp.ne.s32.totalorder %s4864_s1, %s3716_s27  ;;  %s3720_s26 = scalar_lea.hbm %s5853_s13, 64 }
 0x151   : > { %p3721_p1 = scmp.lt.u32.totalorder %s4864_s1, %s5853_s13  ;;  %p3722_p4 = scmp.lt.u32.totalorder %s3720_s26, %s3716_s27 }
 0x152   : > { %p3718_p13 = pnand %p3717_p3, %p5849_p2  ;;  %p3724_p5 = scmp.lt.u32.totalorder %s3716_s27, %s4864_s1 }
 0x153   : > { %p3723_p11 = por %p3722_p4, %p3721_p1 }
 0x154   : > { %s4898_s21 = scalar_lea.hbm %s5856_s8, %s4775_s23  ;;  %p3719_p12 = pneg %p3718_p13 }
 0x155   : > { %p3725_p0 = por %p3724_p5, %p3723_p11 }
 0x157   : > { %p3726_p8 = pnand %p3725_p0, %p3719_p12 }
 0x159   : > { %3729 = shalt.err (!%p3726_p8)
}
 0x15a   : > { %s3730_s0 = scalar_lea.vmem %s4892_s2, 32  ;;  %s4335_s19 = smov [#allocation14]  }
 0x15b   : > { %p3731_p6 = scmp.ne.s32.totalorder %s4892_s2, %s3730_s0  ;;  %s3734_s22 = sshll.u32 %s4335_s19, 4  ;;  %s3735_s22 = int_to_ptr.vmem [resolvable:$false] %s3734_s22 }
 0x15c   : > { %s3736_s3 = scalar_lea.vmem %s3735_s22, 64  ;;  %p3737_p10 = scmp.lt.s32.totalorder %s4892_s2, %s3735_s22 }
 0x15d   : > { %p3732_p9 = pnand %p3731_p6, %p5849_p2  ;;  %p3738_p3 = scmp.lt.s32.totalorder %s3736_s3, %s3730_s0 }
 0x15f   : > { %p3733_p7 = pneg %p3732_p9  ;;  %p3739_p13 = por %p3738_p3, %p3737_p10 }
 0x161   : > { %p3740_p1 = pnand %p3739_p13, %p3733_p7 }
 0x163   : > { %3743 = shalt.err (!%p3740_p1)
}
 0x164   : > { %s5857_s26 = smov 1   ;;  %s5858_s14 = smov 16  }
 0x165   : > { %3250 = dma.hbm_to_vmem [thread:$0]  (%p5849_p2), %s4864_s1, 32, %s4892_s2, %s4747_s25, %s5858_s14, %s5858_s14, %s5857_s26  }
 0x166   : > { %s851_s27 = scalar_lea.vmem [#allocation15], %s4772_s30  ;;  %s4932_s0 = scalar_lea.hbm %s5709_s9, %s4815_s18 }
 0x167   : > { %s858_s28 = sshll.u32 %s851_s27, 4  ;;  %s3744_s19 = scalar_lea.hbm %s4898_s21, 512  ;;  %s4926_s28 = int_to_ptr.vmem [resolvable:$true] %s858_s28 }
 0x168   : > { %p3745_p12 = scmp.ne.s32.totalorder %s4898_s21, %s3744_s19  ;;  %s3748_s13 = scalar_lea.hbm %s5856_s8, 1024 }
 0x169   : > { %p3749_p5 = scmp.lt.u32.totalorder %s4898_s21, %s5856_s8  ;;  %p3750_p0 = scmp.lt.u32.totalorder %s3748_s13, %s3744_s19 }
 0x16a   : > { %p3746_p4 = pnand %p3745_p12, %p5849_p2  ;;  %p3752_p6 = scmp.lt.u32.totalorder %s3744_s19, %s4898_s21 }
 0x16b   : > { %p3751_p8 = por %p3750_p0, %p3749_p5 }
 0x16c   : > { %p3747_p11 = pneg %p3746_p4 }
 0x16d   : > { %p3753_p9 = por %p3752_p6, %p3751_p8 }
 0x16f   : > { %p3754_p7 = pnand %p3753_p9, %p3747_p11 }
 0x171   : > { %3757 = shalt.err (!%p3754_p7)
}
 0x172   : > { %s3758_s18 = scalar_lea.vmem %s4926_s28, 512  ;;  %s4336_s2 = smov [#allocation15]  }
 0x173   : > { %p3759_p10 = scmp.ne.s32.totalorder %s4926_s28, %s3758_s18  ;;  %s3762_s27 = sshll.u32 %s4336_s2, 4  ;;  %s3763_s27 = int_to_ptr.vmem [resolvable:$false] %s3762_s27 }
 0x174   : > { %s3764_s7 = scalar_lea.vmem %s3763_s27, 1024  ;;  %p3765_p1 = scmp.lt.s32.totalorder %s4926_s28, %s3763_s27 }
 0x175   : > { %p3760_p3 = pnand %p3759_p10, %p5849_p2  ;;  %p3766_p12 = scmp.lt.s32.totalorder %s3764_s7, %s3758_s18 }
 0x177   : > { %p3761_p13 = pneg %p3760_p3  ;;  %p3767_p4 = por %p3766_p12, %p3765_p1 }
 0x179   : > { %p3768_p5 = pnand %p3767_p4, %p3761_p13 }
 0x17b   : > { %3771 = shalt.err (!%p3768_p5)
}
 0x17c   : > { %3251 = dma.hbm_to_vmem [thread:$0]  (%p5849_p2), %s4898_s21, 512, %s4926_s28, %s4712_s17, %s5855_s4, %s5855_s4, %s5854_s24  }
 0x17d   : > { %s872_s13 = scalar_lea.vmem [#allocation16], %s4812_s5  ;;  %s2966_s20 = sshll.u32 %s4743_s29, 4 }
 0x17e   : > { %s879_s15 = sshll.u32 %s872_s13, 4  ;;  %s3772_s19 = scalar_lea.hbm %s4932_s0, 32  ;;  %s4961_s15 = int_to_ptr.vmem [resolvable:$true] %s879_s15 }
 0x17f   : > { %p3773_p11 = scmp.ne.s32.totalorder %s4932_s0, %s3772_s19  ;;  %s3776_s1 = scalar_lea.hbm %s5709_s9, 64 }
 0x180   : > { %p3777_p6 = scmp.lt.u32.totalorder %s4932_s0, %s5709_s9  ;;  %p3778_p9 = scmp.lt.u32.totalorder %s3776_s1, %s3772_s19 }
 0x181   : > { %p3774_p0 = pnand %p3773_p11, %p5849_p2  ;;  %p3780_p10 = scmp.lt.u32.totalorder %s3772_s19, %s4932_s0 }
 0x182   : > { %p3779_p7 = por %p3778_p9, %p3777_p6 }
 0x183   : > { %p3775_p8 = pneg %p3774_p0 }
 0x184   : > { %p3781_p3 = por %p3780_p10, %p3779_p7 }
 0x186   : > { %p3782_p13 = pnand %p3781_p3, %p3775_p8 }
 0x188   : > { %3785 = shalt.err (!%p3782_p13)
}
 0x189   : > { %s3786_s5 = scalar_lea.vmem %s4961_s15, 32  ;;  %s4337_s21 = smov [#allocation16]  }
 0x18a   : > { %p3787_p1 = scmp.ne.s32.totalorder %s4961_s15, %s3786_s5  ;;  %s3790_s28 = sshll.u32 %s4337_s21, 4  ;;  %s3791_s28 = int_to_ptr.vmem [resolvable:$false] %s3790_s28 }
 0x18b   : > { %s3792_s27 = scalar_lea.vmem %s3791_s28, 64  ;;  %p3793_p5 = scmp.lt.s32.totalorder %s4961_s15, %s3791_s28 }
 0x18c   : > { %p3788_p12 = pnand %p3787_p1, %p5849_p2  ;;  %p3794_p11 = scmp.lt.s32.totalorder %s3792_s27, %s3786_s5 }
 0x18e   : > { %p3789_p4 = pneg %p3788_p12  ;;  %p3795_p0 = por %p3794_p11, %p3793_p5 }
 0x190   : > { %p3796_p6 = pnand %p3795_p0, %p3789_p4 }
 0x192   : > { %3799 = shalt.err (!%p3796_p6)
}
 0x193   : > { %3252 = dma.hbm_to_vmem [thread:$0]  (%p5849_p2), %s4932_s0, 32, %s4961_s15, %s4747_s25, %s5858_s14, %s5858_s14, %s5857_s26  }
 0x194   : > { %s3081_s7 = sshll.u32 %s4310_s6, 8  ;;  %s893_s13 = scalar_lea.vmem [#allocation17], %s2966_s20 }
 0x195   : > { %s900_s19 = sshll.u32 %s893_s13, 4  ;;  %s4996_s1 = scalar_lea.hbm %s5710_s10, %s3081_s7  ;;  %s4998_s19 = int_to_ptr.vmem [resolvable:$true] %s900_s19 }
 0x196   : > { %s3800_s18 = scalar_lea.hbm %s4996_s1, 256  ;;  %s3804_s0 = scalar_lea.hbm %s5710_s10, 512 }
 0x197   : > { %p3801_p8 = scmp.ne.s32.totalorder %s4996_s1, %s3800_s18  ;;  %p3805_p10 = scmp.lt.u32.totalorder %s4996_s1, %s5710_s10 }
 0x198   : > { %p3806_p3 = scmp.lt.u32.totalorder %s3804_s0, %s3800_s18  ;;  %p3808_p1 = scmp.lt.u32.totalorder %s3800_s18, %s4996_s1 }
 0x199   : > { %p3802_p9 = pnand %p3801_p8, %p5849_p2 }
 0x19a   : > { %p3807_p13 = por %p3806_p3, %p3805_p10 }
 0x19b   : > { %p3803_p7 = pneg %p3802_p9 }
 0x19c   : > { %p3809_p12 = por %p3808_p1, %p3807_p13 }
 0x19e   : > { %p3810_p4 = pnand %p3809_p12, %p3803_p7 }
 0x1a0   : > { %3813 = shalt.err (!%p3810_p4)
}
 0x1a1   : > { %s3814_s5 = scalar_lea.vmem %s4998_s19, 256  ;;  %s4338_s21 = smov [#allocation17]  }
 0x1a2   : > { %p3815_p5 = scmp.ne.s32.totalorder %s4998_s19, %s3814_s5  ;;  %s3818_s28 = sshll.u32 %s4338_s21, 4  ;;  %s3819_s28 = int_to_ptr.vmem [resolvable:$false] %s3818_s28 }
 0x1a3   : > { %s3820_s27 = scalar_lea.vmem %s3819_s28, 512  ;;  %p3821_p6 = scmp.lt.s32.totalorder %s4998_s19, %s3819_s28 }
 0x1a4   : > { %p3816_p11 = pnand %p3815_p5, %p5849_p2  ;;  %p3822_p8 = scmp.lt.s32.totalorder %s3820_s27, %s3814_s5 }
 0x1a6   : > { %p3817_p0 = pneg %p3816_p11  ;;  %p3823_p9 = por %p3822_p8, %p3821_p6 }
 0x1a8   : > { %p3824_p10 = pnand %p3823_p9, %p3817_p0 }
 0x1aa   : > { %3827 = shalt.err (!%p3824_p10)
}
 0x1ab   : > { %3253 = dma.hbm_to_vmem [thread:$0]  (%p5849_p2), %s4996_s1, 256, %s4998_s19, %s4712_s17, %s5855_s4, %s5855_s4, %s5854_s24  }
 0x1ac   : > { %s5026_s13 = sshll.u32 %s4310_s6, 4  ;;  %s913_s26 = scalar_lea.vmem [#allocation18], %s4743_s29 }
 0x1ad   : > { %s5032_s18 = scalar_lea.hbm %s5711_s11, %s5026_s13  ;;  %s920_s14 = sshll.u32 %s913_s26, 4  ;;  %s921_s14 = int_to_ptr.vmem [resolvable:$true] %s920_s14 }
 0x1ae   : > { %s3828_s0 = scalar_lea.hbm %s5032_s18, 16  ;;  %s3832_s15 = scalar_lea.hbm %s5711_s11, 32 }
 0x1af   : > { %p3829_p7 = scmp.ne.s32.totalorder %s5032_s18, %s3828_s0  ;;  %p3833_p1 = scmp.lt.u32.totalorder %s5032_s18, %s5711_s11 }
 0x1b0   : > { %p3834_p12 = scmp.lt.u32.totalorder %s3832_s15, %s3828_s0  ;;  %p3836_p5 = scmp.lt.u32.totalorder %s3828_s0, %s5032_s18 }
 0x1b1   : > { %p3830_p3 = pnand %p3829_p7, %p5849_p2 }
 0x1b2   : > { %p3835_p4 = por %p3834_p12, %p3833_p1 }
 0x1b3   : > { %p3831_p13 = pneg %p3830_p3 }
 0x1b4   : > { %p3837_p11 = por %p3836_p5, %p3835_p4 }
 0x1b6   : > { %p3838_p0 = pnand %p3837_p11, %p3831_p13 }
 0x1b8   : > { %3841 = shalt.err (!%p3838_p0)
}
 0x1b9   : > { %s3842_s21 = scalar_lea.vmem %s921_s14, 16  ;;  %s4339_s28 = smov [#allocation18]  }
 0x1ba   : > { %p3843_p6 = scmp.ne.s32.totalorder %s921_s14, %s3842_s21  ;;  %s3846_s27 = sshll.u32 %s4339_s28, 4  ;;  %s3847_s27 = int_to_ptr.vmem [resolvable:$false] %s3846_s27 }
 0x1bb   : > { %s3848_s22 = scalar_lea.vmem %s3847_s27, 32  ;;  %p3849_p10 = scmp.lt.s32.totalorder %s921_s14, %s3847_s27 }
 0x1bc   : > { %p3844_p8 = pnand %p3843_p6, %p5849_p2  ;;  %p3850_p7 = scmp.lt.s32.totalorder %s3848_s22, %s3842_s21 }
 0x1be   : > { %p3845_p9 = pneg %p3844_p8  ;;  %p3851_p3 = por %p3850_p7, %p3849_p10 }
 0x1c0   : > { %p3852_p1 = pnand %p3851_p3, %p3845_p9 }
 0x1c2   : > { %3855 = shalt.err (!%p3852_p1)
}
 0x1c3   : > { %3254 = dma.hbm_to_vmem [thread:$0]  (%p5849_p2), %s5032_s18, 16, %s921_s14, %s4747_s25  }
 0x1c4   : > { %s5057_s0 = scalar_lea.hbm %s5712_s12, %s5026_s13  ;;  %s930_s19 = scalar_lea.vmem [#allocation19], %s4743_s29 }
 0x1c5   : > { %s937_s1 = sshll.u32 %s930_s19, 4  ;;  %s3856_s15 = scalar_lea.hbm %s5057_s0, 16  ;;  %s938_s1 = int_to_ptr.vmem [resolvable:$true] %s937_s1 }
 0x1c6   : > { %p3857_p13 = scmp.ne.s32.totalorder %s5057_s0, %s3856_s15  ;;  %s3860_s18 = scalar_lea.hbm %s5712_s12, 32 }
 0x1c7   : > { %p3861_p5 = scmp.lt.u32.totalorder %s5057_s0, %s5712_s12  ;;  %p3862_p11 = scmp.lt.u32.totalorder %s3860_s18, %s3856_s15 }
 0x1c8   : > { %p3858_p12 = pnand %p3857_p13, %p5849_p2  ;;  %p3864_p6 = scmp.lt.u32.totalorder %s3856_s15, %s5057_s0 }
 0x1c9   : > { %p3863_p0 = por %p3862_p11, %p3861_p5 }
 0x1ca   : > { %p3859_p4 = pneg %p3858_p12 }
 0x1cb   : > { %p3865_p8 = por %p3864_p6, %p3863_p0 }
 0x1cd   : > { %p3866_p9 = pnand %p3865_p8, %p3859_p4 }
 0x1cf   : > { %3869 = shalt.err (!%p3866_p9)
}
 0x1d0   : > { %s3870_s28 = scalar_lea.vmem %s938_s1, 16  ;;  %s4340_s27 = smov [#allocation19]  }
 0x1d1   : > { %p3871_p10 = scmp.ne.s32.totalorder %s938_s1, %s3870_s28  ;;  %s3874_s22 = sshll.u32 %s4340_s27, 4  ;;  %s3875_s22 = int_to_ptr.vmem [resolvable:$false] %s3874_s22 }
 0x1d2   : > { %s3876_s3 = scalar_lea.vmem %s3875_s22, 32  ;;  %p3877_p1 = scmp.lt.s32.totalorder %s938_s1, %s3875_s22 }
 0x1d3   : > { %p3872_p7 = pnand %p3871_p10, %p5849_p2  ;;  %p3878_p13 = scmp.lt.s32.totalorder %s3876_s3, %s3870_s28 }
 0x1d5   : > { %p3873_p3 = pneg %p3872_p7  ;;  %p3879_p12 = por %p3878_p13, %p3877_p1 }
 0x1d7   : > { %p3880_p5 = pnand %p3879_p12, %p3873_p3 }
 0x1d9   : > { %3883 = shalt.err (!%p3880_p5)
}
 0x1da   : > { %3255 = dma.hbm_to_vmem [thread:$0]  (%p5849_p2), %s5057_s0, 16, %s938_s1, %s4712_s17  }
 0x1db   : > { %s5859_s15 = sld [smem:[#allocation85_spill]]  ;;  %s947_s5 = scalar_lea.vmem [#allocation20], %s4743_s29 }
 0x1dc   : > { %s954_s18 = sshll.u32 %s947_s5, 4  ;;  %s955_s18 = int_to_ptr.vmem [resolvable:$true] %s954_s18 }
 0x1e1   : > { %s5082_s2 = scalar_lea.hbm %s5859_s15, %s5026_s13  ;;  %s3888_s0 = scalar_lea.hbm %s5859_s15, 32 }
 0x1e2   : > { %s3884_s14 = scalar_lea.hbm %s5082_s2, 16  ;;  %p3889_p6 = scmp.lt.u32.totalorder %s5082_s2, %s5859_s15 }
 0x1e3   : > { %p3885_p4 = scmp.ne.s32.totalorder %s5082_s2, %s3884_s14  ;;  %p3890_p8 = scmp.lt.u32.totalorder %s3888_s0, %s3884_s14 }
 0x1e4   : > { %p3892_p10 = scmp.lt.u32.totalorder %s3884_s14, %s5082_s2 }
 0x1e5   : > { %p3886_p11 = pnand %p3885_p4, %p5849_p2  ;;  %p3891_p9 = por %p3890_p8, %p3889_p6 }
 0x1e7   : > { %p3887_p0 = pneg %p3886_p11  ;;  %p3893_p7 = por %p3892_p10, %p3891_p9 }
 0x1e9   : > { %p3894_p3 = pnand %p3893_p7, %p3887_p0 }
 0x1eb   : > { %3897 = shalt.err (!%p3894_p3)
}
 0x1ec   : > { %s3898_s22 = scalar_lea.vmem %s955_s18, 16  ;;  %s4341_s3 = smov [#allocation20]  }
 0x1ed   : > { %p3899_p1 = scmp.ne.s32.totalorder %s955_s18, %s3898_s22  ;;  %s3902_s26 = sshll.u32 %s4341_s3, 4  ;;  %s3903_s26 = int_to_ptr.vmem [resolvable:$false] %s3902_s26 }
 0x1ee   : > { %s3904_s19 = scalar_lea.vmem %s3903_s26, 32  ;;  %p3905_p5 = scmp.lt.s32.totalorder %s955_s18, %s3903_s26 }
 0x1ef   : > { %p3900_p13 = pnand %p3899_p1, %p5849_p2  ;;  %p3906_p4 = scmp.lt.s32.totalorder %s3904_s19, %s3898_s22 }
 0x1f1   : > { %p3901_p12 = pneg %p3900_p13  ;;  %p3907_p11 = por %p3906_p4, %p3905_p5 }
 0x1f3   : > { %p3908_p6 = pnand %p3907_p11, %p3901_p12 }
 0x1f5   : > { %3911 = shalt.err (!%p3908_p6)
}
 0x1f6   : > { %3256 = dma.hbm_to_vmem [thread:$0]  (%p5849_p2), %s5082_s2, 16, %s955_s18, %s4747_s25  }
 0x1f7   : > { %s5860_s21 = sld [smem:[#allocation86_spill]]  ;;  %s965_s0 = scalar_lea.vmem [#allocation21], %s2966_s20 }
 0x1f8   : > { %s972_s1 = sshll.u32 %s965_s0, 4  ;;  %s5112_s1 = int_to_ptr.vmem [resolvable:$true] %s972_s1 }
 0x1fd   : > { %s5108_s28 = scalar_lea.hbm %s5860_s21, %s3081_s7  ;;  %s3916_s22 = scalar_lea.hbm %s5860_s21, 512 }
 0x1fe   : > { %s3912_s27 = scalar_lea.hbm %s5108_s28, 256  ;;  %p3917_p10 = scmp.lt.u32.totalorder %s5108_s28, %s5860_s21 }
 0x1ff   : > { %p3913_p0 = scmp.ne.s32.totalorder %s5108_s28, %s3912_s27  ;;  %p3918_p7 = scmp.lt.u32.totalorder %s3916_s22, %s3912_s27 }
 0x200   : > { %p3920_p1 = scmp.lt.u32.totalorder %s3912_s27, %s5108_s28 }
 0x201   : > { %p3914_p8 = pnand %p3913_p0, %p5849_p2  ;;  %p3919_p3 = por %p3918_p7, %p3917_p10 }
 0x203   : > { %p3915_p9 = pneg %p3914_p8  ;;  %p3921_p13 = por %p3920_p1, %p3919_p3 }
 0x205   : > { %p3922_p12 = pnand %p3921_p13, %p3915_p9 }
 0x207   : > { %3925 = shalt.err (!%p3922_p12)
}
 0x208   : > { %s3926_s20 = scalar_lea.vmem %s5112_s1, 256  ;;  %s4342_s26 = smov [#allocation21]  }
 0x209   : > { %p3927_p5 = scmp.ne.s32.totalorder %s5112_s1, %s3926_s20  ;;  %s3930_s19 = sshll.u32 %s4342_s26, 4  ;;  %s3931_s19 = int_to_ptr.vmem [resolvable:$false] %s3930_s19 }
 0x20a   : > { %s3932_s5 = scalar_lea.vmem %s3931_s19, 512  ;;  %p3933_p6 = scmp.lt.s32.totalorder %s5112_s1, %s3931_s19 }
 0x20b   : > { %p3928_p4 = pnand %p3927_p5, %p5849_p2  ;;  %p3934_p0 = scmp.lt.s32.totalorder %s3932_s5, %s3926_s20 }
 0x20d   : > { %p3929_p11 = pneg %p3928_p4  ;;  %p3935_p8 = por %p3934_p0, %p3933_p6 }
 0x20f   : > { %p3936_p10 = pnand %p3935_p8, %p3929_p11 }
 0x211   : > { %3939 = shalt.err (!%p3936_p10)
}
 0x212   : > { %3257 = dma.hbm_to_vmem [thread:$0]  (%p5849_p2), %s5108_s28, 256, %s5112_s1, %s4712_s17, %s5855_s4, %s5855_s4, %s5854_s24  }
 0x213   : > { %s5861_s27 = sld [smem:[#allocation87_spill]]  ;;  %s985_s22 = scalar_lea.vmem [#allocation22], %s4743_s29 }
 0x214   : > { %s992_s7 = sshll.u32 %s985_s22, 4  ;;  %s993_s7 = int_to_ptr.vmem [resolvable:$true] %s992_s7 }
 0x219   : > { %s5862_s18 = smov %s5861_s27  ;;  %s5143_s2 = scalar_lea.hbm %s5861_s27, %s5026_s13 }
 0x21a   : > { %s3940_s3 = scalar_lea.hbm %s5143_s2, 16  ;;  %s3944_s28 = scalar_lea.hbm %s5862_s18, 32 }
 0x21b   : > { %p3941_p9 = scmp.ne.s32.totalorder %s5143_s2, %s3940_s3  ;;  %p3945_p1 = scmp.lt.u32.totalorder %s5143_s2, %s5862_s18 }
 0x21c   : > { %p3946_p13 = scmp.lt.u32.totalorder %s3944_s28, %s3940_s3  ;;  %p3948_p5 = scmp.lt.u32.totalorder %s3940_s3, %s5143_s2 }
 0x21d   : > { %p3942_p7 = pnand %p3941_p9, %p5849_p2 }
 0x21e   : > { %p3947_p12 = por %p3946_p13, %p3945_p1 }
 0x21f   : > { %p3943_p3 = pneg %p3942_p7 }
 0x220   : > { %p3949_p4 = por %p3948_p5, %p3947_p12 }
 0x222   : > { %p3950_p11 = pnand %p3949_p4, %p3943_p3 }
 0x224   : > { %3953 = shalt.err (!%p3950_p11)
}
 0x225   : > { %s3954_s5 = scalar_lea.vmem %s993_s7, 16  ;;  %s4343_s14 = smov [#allocation22]  }
 0x226   : > { %p3955_p6 = scmp.ne.s32.totalorder %s993_s7, %s3954_s5  ;;  %s3958_s0 = sshll.u32 %s4343_s14, 4  ;;  %s3959_s0 = int_to_ptr.vmem [resolvable:$false] %s3958_s0 }
 0x227   : > { %s3960_s27 = scalar_lea.vmem %s3959_s0, 32  ;;  %p3961_p10 = scmp.lt.s32.totalorder %s993_s7, %s3959_s0 }
 0x228   : > { %p3956_p0 = pnand %p3955_p6, %p5849_p2  ;;  %p3962_p9 = scmp.lt.s32.totalorder %s3960_s27, %s3954_s5 }
 0x22a   : > { %p3957_p8 = pneg %p3956_p0  ;;  %p3963_p7 = por %p3962_p9, %p3961_p10 }
 0x22c   : > { %p3964_p1 = pnand %p3963_p7, %p3957_p8 }
 0x22e   : > { %3967 = shalt.err (!%p3964_p1)
}
 0x22f   : > { %3258 = dma.hbm_to_vmem [thread:$0]  (%p5849_p2), %s5143_s2, 16, %s993_s7, %s4747_s25  }
 0x230   : > { %s5863_s20 = sld [smem:[#allocation88_spill]]  ;;  %s1003_s28 = scalar_lea.vmem [#allocation23], %s4772_s30 }
 0x231   : > { %s1010_s1 = sshll.u32 %s1003_s28, 4  ;;  %s5171_s1 = int_to_ptr.vmem [resolvable:$true] %s1010_s1 }
 0x236   : > { %s5168_s26 = scalar_lea.hbm %s5863_s20, %s4775_s23  ;;  %s3972_s7 = scalar_lea.hbm %s5863_s20, 1024 }
 0x237   : > { %s3968_s19 = scalar_lea.hbm %s5168_s26, 512  ;;  %p3973_p5 = scmp.lt.u32.totalorder %s5168_s26, %s5863_s20 }
 0x238   : > { %p3969_p3 = scmp.ne.s32.totalorder %s5168_s26, %s3968_s19  ;;  %p3974_p4 = scmp.lt.u32.totalorder %s3972_s7, %s3968_s19 }
 0x239   : > { %p3976_p6 = scmp.lt.u32.totalorder %s3968_s19, %s5168_s26 }
 0x23a   : > { %p3970_p13 = pnand %p3969_p3, %p5849_p2  ;;  %p3975_p11 = por %p3974_p4, %p3973_p5 }
 0x23c   : > { %p3971_p12 = pneg %p3970_p13  ;;  %p3977_p0 = por %p3976_p6, %p3975_p11 }
 0x23e   : > { %p3978_p8 = pnand %p3977_p0, %p3971_p12 }
 0x240   : > { %3981 = shalt.err (!%p3978_p8)
}
 0x241   : > { %s3982_s30 = scalar_lea.vmem %s5171_s1, 512  ;;  %s4344_s0 = smov [#allocation23]  }
 0x242   : > { %p3983_p10 = scmp.ne.s32.totalorder %s5171_s1, %s3982_s30  ;;  %s3986_s27 = sshll.u32 %s4344_s0, 4  ;;  %s3987_s27 = int_to_ptr.vmem [resolvable:$false] %s3986_s27 }
 0x243   : > { %s3988_s22 = scalar_lea.vmem %s3987_s27, 1024  ;;  %p3989_p1 = scmp.lt.s32.totalorder %s5171_s1, %s3987_s27 }
 0x244   : > { %p3984_p9 = pnand %p3983_p10, %p5849_p2  ;;  %p3990_p3 = scmp.lt.s32.totalorder %s3988_s22, %s3982_s30 }
 0x246   : > { %p3985_p7 = pneg %p3984_p9  ;;  %p3991_p13 = por %p3990_p3, %p3989_p1 }
 0x248   : > { %p3992_p5 = pnand %p3991_p13, %p3985_p7 }
 0x24a   : > { %3995 = shalt.err (!%p3992_p5)
}
 0x24b   : > { %3259 = dma.hbm_to_vmem [thread:$0]  (%p5849_p2), %s5168_s26, 512, %s5171_s1, %s4712_s17, %s5855_s4, %s5855_s4, %s5854_s24  }
 0x24c   : > { %s5864_s19 = sld [smem:[#allocation89_spill]]  ;;  %s1023_s2 = scalar_lea.vmem [#allocation24], %s4743_s29 }
 0x24d   : > { %s1030_s7 = sshll.u32 %s1023_s2, 4  ;;  %s1031_s7 = int_to_ptr.vmem [resolvable:$true] %s1030_s7 }
 0x252   : > { %s5202_s5 = scalar_lea.hbm %s5864_s19, %s5026_s13  ;;  %s4000_s24 = scalar_lea.hbm %s5864_s19, 32 }
 0x253   : > { %s3996_s14 = scalar_lea.hbm %s5202_s5, 16  ;;  %p4001_p6 = scmp.lt.u32.totalorder %s5202_s5, %s5864_s19 }
 0x254   : > { %p3997_p12 = scmp.ne.s32.totalorder %s5202_s5, %s3996_s14  ;;  %p4002_p0 = scmp.lt.u32.totalorder %s4000_s24, %s3996_s14 }
 0x255   : > { %p4004_p10 = scmp.lt.u32.totalorder %s3996_s14, %s5202_s5 }
 0x256   : > { %p3998_p4 = pnand %p3997_p12, %p5849_p2  ;;  %p4003_p8 = por %p4002_p0, %p4001_p6 }
 0x258   : > { %p3999_p11 = pneg %p3998_p4  ;;  %p4005_p9 = por %p4004_p10, %p4003_p8 }
 0x25a   : > { %p4006_p7 = pnand %p4005_p9, %p3999_p11 }
 0x25c   : > { %4009 = shalt.err (!%p4006_p7)
}
 0x25d   : > { %s4010_s1 = scalar_lea.vmem %s1031_s7, 16  ;;  %s4345_s0 = smov [#allocation24]  }
 0x25e   : > { %p4011_p1 = scmp.ne.s32.totalorder %s1031_s7, %s4010_s1  ;;  %s4014_s27 = sshll.u32 %s4345_s0, 4  ;;  %s4015_s27 = int_to_ptr.vmem [resolvable:$false] %s4014_s27 }
 0x25f   : > { %s4016_s22 = scalar_lea.vmem %s4015_s27, 32  ;;  %p4017_p5 = scmp.lt.s32.totalorder %s1031_s7, %s4015_s27 }
 0x260   : > { %p4012_p3 = pnand %p4011_p1, %p5849_p2  ;;  %p4018_p12 = scmp.lt.s32.totalorder %s4016_s22, %s4010_s1 }
 0x262   : > { %p4013_p13 = pneg %p4012_p3  ;;  %p4019_p4 = por %p4018_p12, %p4017_p5 }
 0x264   : > { %p4020_p0 = pnand %p4019_p4, %p4013_p13 }
 0x266   : > { %4023 = shalt.err (!%p4020_p0)
}
 0x267   : > { %3260 = dma.hbm_to_vmem [thread:$0]  (%p5849_p2), %s5202_s5, 16, %s1031_s7, %s4747_s25  }
 0x268   : > { %s5865_s2 = sld [smem:[#allocation90_spill]]  ;;  %s1040_s30 = scalar_lea.vmem [#allocation25], %s4743_s29 }
 0x269   : > { %s1047_s24 = sshll.u32 %s1040_s30, 4  ;;  %s1048_s24 = int_to_ptr.vmem [resolvable:$true] %s1047_s24 }
 0x26e   : > { %s5866_s14 = smov %s5865_s2  ;;  %s5227_s23 = scalar_lea.hbm %s5865_s2, %s5026_s13 }
 0x26f   : > { %s4024_s4 = scalar_lea.hbm %s5227_s23, 16  ;;  %s4028_s5 = scalar_lea.hbm %s5866_s14, 32 }
 0x270   : > { %p4025_p11 = scmp.ne.s32.totalorder %s5227_s23, %s4024_s4  ;;  %p4029_p10 = scmp.lt.u32.totalorder %s5227_s23, %s5866_s14 }
 0x271   : > { %p4030_p9 = scmp.lt.u32.totalorder %s4028_s5, %s4024_s4  ;;  %p4032_p1 = scmp.lt.u32.totalorder %s4024_s4, %s5227_s23 }
 0x272   : > { %p4026_p6 = pnand %p4025_p11, %p5849_p2 }
 0x273   : > { %p4031_p7 = por %p4030_p9, %p4029_p10 }
 0x274   : > { %p4027_p8 = pneg %p4026_p6 }
 0x275   : > { %p4033_p3 = por %p4032_p1, %p4031_p7 }
 0x277   : > { %p4034_p13 = pnand %p4033_p3, %p4027_p8 }
 0x279   : > { %4037 = shalt.err (!%p4034_p13)
}
 0x27a   : > { %s4038_s27 = scalar_lea.vmem %s1048_s24, 16  ;;  %s4346_s22 = smov [#allocation25]  }
 0x27b   : > { %p4039_p5 = scmp.ne.s32.totalorder %s1048_s24, %s4038_s27  ;;  %s4042_s3 = sshll.u32 %s4346_s22, 4  ;;  %s4043_s3 = int_to_ptr.vmem [resolvable:$false] %s4042_s3 }
 0x27c   : > { %s4044_s28 = scalar_lea.vmem %s4043_s3, 32  ;;  %p4045_p0 = scmp.lt.s32.totalorder %s1048_s24, %s4043_s3 }
 0x27d   : > { %p4040_p12 = pnand %p4039_p5, %p5849_p2  ;;  %p4046_p11 = scmp.lt.s32.totalorder %s4044_s28, %s4038_s27 }
 0x27f   : > { %p4041_p4 = pneg %p4040_p12  ;;  %p4047_p6 = por %p4046_p11, %p4045_p0 }
 0x281   : > { %p4048_p9 = pnand %p4047_p6, %p4041_p4 }
 0x283   : > { %4051 = shalt.err (!%p4048_p9)
}
 0x284   : > { %3261 = dma.hbm_to_vmem [thread:$0]  (%p5849_p2), %s5227_s23, 16, %s1048_s24, %s4712_s17  }
 0x285   : > { %s5867_s4 = sld [smem:[#allocation91_spill]]  ;;  %s1057_s1 = scalar_lea.vmem [#allocation26], %s4743_s29 }
 0x286   : > { %s1064_s5 = sshll.u32 %s1057_s1, 4  ;;  %s1065_s5 = int_to_ptr.vmem [resolvable:$true] %s1064_s5 }
 0x28b   : > { %s5868_s0 = smov %s5867_s4  ;;  %s5252_s26 = scalar_lea.hbm %s5867_s4, %s5026_s13 }
 0x28c   : > { %s4052_s7 = scalar_lea.hbm %s5252_s26, 16  ;;  %s4056_s17 = scalar_lea.hbm %s5868_s0, 32 }
 0x28d   : > { %p4053_p8 = scmp.ne.s32.totalorder %s5252_s26, %s4052_s7  ;;  %p4057_p1 = scmp.lt.u32.totalorder %s5252_s26, %s5868_s0 }
 0x28e   : > { %p4058_p3 = scmp.lt.u32.totalorder %s4056_s17, %s4052_s7  ;;  %p4060_p5 = scmp.lt.u32.totalorder %s4052_s7, %s5252_s26 }
 0x28f   : > { %p4054_p10 = pnand %p4053_p8, %p5849_p2 }
 0x290   : > { %p4059_p13 = por %p4058_p3, %p4057_p1 }
 0x291   : > { %p4055_p7 = pneg %p4054_p10 }
 0x292   : > { %p4061_p12 = por %p4060_p5, %p4059_p13 }
 0x294   : > { %p4062_p4 = pnand %p4061_p12, %p4055_p7 }
 0x296   : > { %4065 = shalt.err (!%p4062_p4)
}
 0x297   : > { %s4066_s29 = scalar_lea.vmem %s1065_s5, 16  ;;  %s4347_s13 = smov [#allocation26]  }
 0x298   : > { %p4067_p0 = scmp.ne.s32.totalorder %s1065_s5, %s4066_s29  ;;  %s4070_s3 = sshll.u32 %s4347_s13, 4  ;;  %s4071_s3 = int_to_ptr.vmem [resolvable:$false] %s4070_s3 }
 0x299   : > { %s4072_s28 = scalar_lea.vmem %s4071_s3, 32  ;;  %p4073_p9 = scmp.lt.s32.totalorder %s1065_s5, %s4071_s3 }
 0x29a   : > { %p4068_p11 = pnand %p4067_p0, %p5849_p2  ;;  %p4074_p8 = scmp.lt.s32.totalorder %s4072_s28, %s4066_s29 }
 0x29c   : > { %p4069_p6 = pneg %p4068_p11  ;;  %p4075_p10 = por %p4074_p8, %p4073_p9 }
 0x29e   : > { %p4076_p1 = pnand %p4075_p10, %p4069_p6 }
 0x2a0   : > { %4079 = shalt.err (!%p4076_p1)
}
 0x2a1   : > { %3262 = dma.hbm_to_vmem [thread:$0]  (%p5849_p2), %s5252_s26, 16, %s1065_s5, %s4747_s25  }
 0x2a2 PF: > { %s5869_s2 = sld [smem:[#allocation75_spill]] }
 0x2a8   : > { %p5870_p7 = scmp.ne.s32.totalorder %s5869_s2, 0 }
 0x2a9   : > { %s5871_s30 = sld [smem:[#allocation66_spill]] (!%p5870_p7)  ;;  %s5872_s4 = sld [smem:[#allocation60_spill]] (!%p5870_p7) }
 0x2aa   : > { %1073 = sbr.rel (%p5870_p7) target bundleno = 4392 (0x1128), region = 108  ;;  %s5873_s1 = sld [smem:[#allocation69_spill]] (!%p5870_p7) }
 0x2af   : > { %s1075_s7 = sand.u32 (!%p5870_p7), 1, %s5871_s30   ;;  %s5277_s27 = sand.u32 (!%p5870_p7), 1, %s5872_s4  }
 0x2b0   : > { %s2983_s22 = sshll.u32 (!%p5870_p7), %s5277_s27, 3  ;;  %s5280_s17 = scalar_lea.sflag (!%p5870_p7), [#allocation4], %s1075_s7 }
 0x2b1   : > { %s5284_s16 = scalar_lea.vmem [#allocation3], %s2983_s22  ;;  %p5874_p2 = scmp.ne.s32.totalorder %s5873_s1, 0 }
 0x2b3   : > { %4181 = dma.done.wait (%p5874_p2), %s5280_s17, 128  }
 0x2b4   : > { %4183 = vsyncadd (%p5874_p2), %s5280_s17, 4294967168  ;;  %s5292_s25 = scalar_lea.sflag [#allocation7], %s1075_s7 }
 0x2b5   : > { %4185 = dma.done.wait (%p5874_p2), %s5292_s25, 16  }
 0x2b6   : > { %4187 = vsyncadd (%p5874_p2), %s5292_s25, 4294967280  ;;  %p5875_p3 = scmp.eq.s32.totalorder %s5871_s30, 0 }
 0x2b8   : > { %4189 = dma.done.wait (%p5875_p3), [#allocation7], 16   ;;  %p5876_p13 = pmov %p5875_p3 }
 0x2b9   : > { %p5877_p5 = pmov %p5875_p3 }
 0x2ba   : > { %4191 = vsyncadd (%p5876_p13), [#allocation7], 4294967280 }
 0x2bb   : > { %4193 = dma.done.wait (%p5877_p5), [#allocation10], 16   ;;  %p5878_p12 = pmov %p5875_p3 }
 0x2bc   : > { %s5879_s5 = sld [smem:[#allocation57_spill]]  ;;  %s5880_s23 = sld [smem:[#allocation72_spill]] }
 0x2bd   : > { %4195 = vsyncadd (%p5878_p12), [#allocation10], 4294967280 }
 0x2c2   : > { %s5310_s24 = sand.u32 1, %s5879_s5   ;;  %p5881_p4 = scmp.ne.s32.totalorder %s5880_s23, 0 }
 0x2c3   : > { %s5313_s29 = sshll.u32 %s5310_s24, 5 }
 0x2c4   : > { %s5316_s13 = scalar_lea.vmem [#allocation11], %s5313_s29 }
 0x2c5   : > { %4197 = dma.done.wait (%p5881_p4), %s5280_s17, 512  }
 0x2c6   : > { %4199 = vsyncadd (%p5881_p4), %s5280_s17, 4294966784  ;;  %s5325_s3 = sshll.u32 %s5310_s24, 1 }
 0x2c7   : > { %4201 = dma.done.wait (%p5881_p4), %s5292_s25, 32  }
 0x2c8   : > { %4203 = vsyncadd (%p5881_p4), %s5292_s25, 4294967264  ;;  %s5335_s2 = scalar_lea.vmem [#allocation13], %s5313_s29 }
 0x2c9   : > { %4205 = dma.done.wait (%p5881_p4), %s5280_s17, 512  }
 0x2ca   : > { %4207 = vsyncadd (%p5881_p4), %s5280_s17, 4294966784 }
 0x2cb   : > { %4209 = dma.done.wait (%p5881_p4), %s5292_s25, 32  }
 0x2cc   : > { %4211 = vsyncadd (%p5881_p4), %s5292_s25, 4294967264  ;;  %s5351_s1 = scalar_lea.vmem [#allocation15], %s5313_s29 }
 0x2cd   : > { %4213 = dma.done.wait (%p5881_p4), %s5280_s17, 512  }
 0x2ce   : > { %4215 = vsyncadd (%p5881_p4), %s5280_s17, 4294966784 }
 0x2cf   : > { %4217 = dma.done.wait (%p5881_p4), %s5292_s25, 32  }
 0x2d0   : > { %4219 = vsyncadd (%p5881_p4), %s5292_s25, 4294967264  ;;  %s2992_s5 = sshll.u32 %s5310_s24, 4 }
 0x2d1   : > { %s5367_s26 = scalar_lea.vmem [#allocation17], %s2992_s5 }
 0x2d2   : > { %4221 = dma.done.wait (%p5881_p4), %s5280_s17, 256  }
 0x2d3   : > { %4223 = vsyncadd (%p5881_p4), %s5280_s17, 4294967040 }
 0x2d4   : > { %4225 = dma.done.wait (%p5881_p4), %s5292_s25, 16  }
 0x2d5   : > { %4227 = vsyncadd (%p5881_p4), %s5292_s25, 4294967280  ;;  %s1174_s28 = scalar_lea.vmem [#allocation19], %s5310_s24 }
 0x2d6   : > { %4229 = dma.done.wait (%p5881_p4), %s5280_s17, 16  }
 0x2d7   : > { %4231 = vsyncadd (%p5881_p4), %s5280_s17, 4294967280 }
 0x2d8   : > { %4233 = dma.done.wait (%p5881_p4), %s5292_s25, 16  }
 0x2d9   : > { %4235 = vsyncadd (%p5881_p4), %s5292_s25, 4294967280  ;;  %s5396_s4 = scalar_lea.vmem [#allocation21], %s2992_s5 }
 0x2da   : > { %4237 = dma.done.wait (%p5881_p4), %s5280_s17, 256  }
 0x2db   : > { %4239 = vsyncadd (%p5881_p4), %s5280_s17, 4294967040 }
 0x2dc   : > { %4241 = dma.done.wait (%p5881_p4), %s5292_s25, 16  }
 0x2dd   : > { %4243 = vsyncadd (%p5881_p4), %s5292_s25, 4294967280  ;;  %s5412_s5 = scalar_lea.vmem [#allocation23], %s5313_s29 }
 0x2de   : > { %4245 = dma.done.wait (%p5881_p4), %s5280_s17, 512  }
 0x2df   : > { %4247 = vsyncadd (%p5881_p4), %s5280_s17, 4294966784 }
 0x2e0   : > { %4249 = dma.done.wait (%p5881_p4), %s5292_s25, 16  }
 0x2e1   : > { %4251 = vsyncadd (%p5881_p4), %s5292_s25, 4294967280  ;;  %s1224_s29 = scalar_lea.vmem [#allocation25], %s5310_s24 }
 0x2e2   : > { %4253 = dma.done.wait (%p5881_p4), %s5280_s17, 16  }
 0x2e3   : > { %4255 = vsyncadd (%p5881_p4), %s5280_s17, 4294967280 }
 0x2e4   : > { %4257 = dma.done.wait (%p5881_p4), %s5292_s25, 16  }
 0x2e5   : > { %4259 = vsyncadd (%p5881_p4), %s5292_s25, 4294967280  ;;  %p5882_p0 = pmov %p5875_p3 }
 0x2e7   : > { %4261 = dma.done.wait (%p5882_p0), [#allocation10], 256   ;;  %p5883_p11 = pmov %p5882_p0 }
 0x2e8   : > { %p5884_p6 = pmov %p5882_p0 }
 0x2e9   : > { %4263 = vsyncadd (%p5883_p11), [#allocation10], 4294967040 }
 0x2ea   : > { %4265 = dma.done.wait (%p5884_p6), [#allocation29], 16   ;;  %p5885_p9 = pmov %p5882_p0 }
 0x2eb   : > { %s5451_s17 = scalar_lea.vmem [#allocation30], %s2983_s22  ;;  %s1383_s23 = scalar_lea.vmem [#allocation31], %s5277_s27 }
 0x2ec   : > { %4267 = vsyncadd (%p5885_p9), [#allocation29], 4294967280  ;;  %s5886_s7 = sld [smem:[#allocation62_spill]] }
 0x2f2   : > { %p2998_p8 = scmp.ne.s32.totalorder %s5886_s7, 0 }
 0x2f3   : > { %v1389_v0 = vld [vmem:[%s5284_s16] sm:$0xff] (!%p2998_p8)  ;;  %vm1392_vm0 = vcmask (!%p2998_p8), 261120   ;;  %v2999_v11 = vld [vmem:[#allocation8] ss:$0 sm:$0xff] (!%p2998_p8)  ;;  %v3000_v13 = vld [vmem:[#allocation9] ss:$0 sm:$0xff] (!%p2998_p8) }
 0x2f4   : > { %1388 = sbr.rel (%p2998_p8) target bundleno = 1070 (0x42e), region = 200  ;;  %v1393_v1 = vsel (!%p2998_p8), %vm1392_vm0, %v1389_v0, 0.0 }
 0x2f5   : > { %1394 = vadd.xlane.f32.xlu0 (!%p2998_p8), %v1393_v1 }
 0x382   : > { %v1395_v2 = vpop.xlane.xlu0 %1394 }
 0x383   : > { %v1397_v3 = vmul.f32 0.03125, %v1395_v2 }
 0x385   : > { %v1398_v4 = vsub.f32 %v1389_v0, %v1397_v3 }
 0x387   : > { %v1399_v5 = vmul.f32 %v1398_v4, %v1398_v4 }
 0x389   : > { %v1400_v6 = vsel %vm1392_vm0, %v1399_v5, 0.0 }
 0x38a   : > { %1401 = vadd.xlane.f32.xlu0 %v1400_v6 }
 0x417   : > { %v1402_v7 = vpop.xlane.xlu0 %1401 }
 0x418   : > { %v1403_v8 = vmul.f32 0.03125, %v1402_v7 }
 0x41a   : > { %v1404_v9 = vadd.f32 1e-12, %v1403_v8 }
 0x41c   : > { %3424 = vrsqrt.f32 %v1404_v9 }
 0x426   : > { %v3425_v10 = vpop.eup %3424 }
 0x427   : > { %v1406_v12 = vmul.f32 %v3425_v10, %v1398_v4 }
 0x429   : > { %v1413_v14 = vmul.f32 %v2999_v11, %v1406_v12 }
 0x42b   : > { %v1420_v15 = vadd.f32 %v3000_v13, %v1413_v14 }
 0x42d   : > { %1421 = vst.msk [vmem:[#allocation2] sm:$0xff] %vm1392_vm0, %v1420_v15 }
 0x42e PF: > { %v3426_v16 = vld [vmem:[%s5335_s2] sm:$0xff]   ;;  %v4348_v17 = vmov 0.0   ;;  %v3427_v18 = vld [vmem:[%s5335_s2 + $0x8] sm:$0xff]   ;;  %vm4349_vm1 = vmmov 0   ;;  %vm1448_vm2 = vcmask 261120   ;;  %s5887_s30 = scalar_lea.vmem [#allocation14], %s5325_s3 }
 0x42f   : > { %3133 = vmatprep.subr.bf16.mxu1 %v4348_v17  ;;  %3125 = vmatprep.subr.bf16.mxu0 %v4348_v17  ;;  %v3428_v19 = vld [vmem:[%s5316_s13] sm:$0xff]   ;;  %v3429_v21 = vld [vmem:[%s5316_s13 + $0x8] sm:$0xff]   ;;  %vm1626_vm3 = vcmask 130048   ;;  %s5888_s22 = scalar_lea.vmem [#allocation12], %s5325_s3  ;;  %v3431_v39 = vld [vmem:[%s5351_s1 + $0x8] sm:$0xff]   ;;  %s5889_s16 = scalar_lea.vmem [#allocation6], %s5277_s27 }
 0x430   : > { %3134 = vmatpush3.bf16.msra.mxu1 %v3426_v16  ;;  %3137 = vmatprep.mubr.msk.bf16.mxu1 %vm4349_vm1, %v4348_v17  ;;  %v3005_v23 = vld [vmem:[%s5887_s30] ss:$0 sm:$0xff]  ;;  %v3001_v28 = vld [vmem:[%s5888_s22] ss:$0 sm:$0xff]  ;;  %v3430_v38 = vld [vmem:[%s5351_s1] sm:$0xff]   ;;  %vm1673_vm4 = vcmask 64512  }
 0x431   : > { %3135 = vmatprep.subr.bf16.mxu1 %v4348_v17  ;;  %3129 = vmatprep.mubr.msk.bf16.mxu0 %vm4349_vm1, %v4348_v17  ;;  %v5506_v40 = vld [vmem:[%s5889_s16] ss:$0 sm:$0xff]  ;;  %s5890_s25 = scalar_lea.vmem [#allocation16], %s5325_s3  ;;  %vm1690_vm5 = vcmask 1043456   ;;  %v3434_v60 = vld [vmem:[%s5316_s13 + $0x10] sm:$0xff]   ;;  %v3435_v61 = vld [vmem:[%s5316_s13 + $0x18] sm:$0xff]   ;;  %s5891_s13 = smov %s5887_s30 }
 0x432   : > { %3126 = vmatpush3.bf16.msra.mxu0 %v3428_v19  ;;  %v3009_v55 = vld [vmem:[%s5890_s25] ss:$0 sm:$0xff]  ;;  %v3432_v1 = vld [vmem:[%s5335_s2 + $0x10] sm:$0xff]   ;;  %v3433_v3 = vld [vmem:[%s5335_s2 + $0x18] sm:$0xff]   ;;  %s5892_s2 = smov %s5888_s22  ;;  %s5895_s3 = scalar_lea.vmem [#allocation20], %s5310_s24  ;;  %vm2296_vm6 = vcmask 523264  }
 0x433   : > { %3127 = vmatprep.subr.bf16.mxu0 %v4348_v17  ;;  %v3030_v12 = vld [vmem:[%s5891_s13 + $0x1] ss:$0 sm:$0xff]  ;;  %s5898_s7 = scalar_lea.vmem [#allocation26], %s5310_s24 }
 0x434   : > { %v5467_v20 = vld [vmem:[#allocation2] sm:$0xff]  ;;  %3136 = vmatpush3.bf16.msra.mxu1 %v3427_v18 }
 0x435   : > { %v5474_v22 = vpack.c.bf16 %v5467_v20, %v5467_v20  ;;  %3149 = vmatprep.subr.bf16.mxu1 %v4348_v17  ;;  %v3021_v18 = vld [vmem:[%s5892_s2 + $0x1] ss:$0 sm:$0xff] }
 0x436   : > { %3128 = vmatpush3.bf16.msra.mxu0 %v3429_v21 }
 0x437   : > { %3138 = vmatmul.mubr.msk.bf16.vlgmr.msra.gmra.mrb[0].mxu1 %vm1448_vm2, %v5474_v22  ;;  %3141 = vmatprep.subr.bf16.mxu0 %v4348_v17 }
 0x438   : > { %3151 = vmatprep.mubr.msk.bf16.mxu1 %vm4349_vm1, %v4348_v17 }
 0x439   : > { %3130 = vmatmul.mubr.msk.bf16.vlgmr.msra.gmra.mrb[0].mxu0 %vm1448_vm2, %v5474_v22 }
 0x43a   : > { %3145 = vmatprep.mubr.msk.bf16.mxu0 %vm4349_vm1, %v4348_v17  ;;  %3142 = vmatpush3.bf16.msra.mxu0 %v3430_v38 }
 0x43b   : > { %3143 = vmatprep.subr.bf16.mxu0 %v4348_v17 }
 0x43e   : > { %3144 = vmatpush3.bf16.msra.mxu0 %v3431_v39 }
 0x43f   : > { %3155 = vmatprep.subr.bf16.mxu0 %v4348_v17 }
 0x441   : > { %3146 = vmatmul.mubr.msk.bf16.vlgmr.msra.gmra.mrb[4].mxu0 %vm1448_vm2, %v5474_v22 }
 0x442   : > { %3157 = vmatprep.mubr.msk.bf16.mxu0 %vm4349_vm1, %v4348_v17 }
 0x50a   : > { %v1549_v24 = vpop.f32.mrb[0].mxu1 }
 0x50b   : > { %v1550_v25 = vadd.f32 %v3005_v23, %v1549_v24  ;;  %v3139_v26 = vpop.f32.mrb[1].mxu1 }
 0x50c   : > { %v1552_v27 = vpop.f32.mrb[2].mxu1  ;;  %v1486_v29 = vpop.f32.mrb[0].mxu0  ;;  %v3436_v26 = vld [vmem:[%s5351_s1 + $0x10] sm:$0xff]  }
 0x50d   : > { %v1619_v30 = vpack.c.bf16 %v1550_v25, %v1550_v25  ;;  %v3140_v31 = vpop.f32.mrb[3].mxu1  ;;  %v3131_v32 = vpop.f32.mrb[1].mxu0  ;;  %v1487_v35 = vadd.f32 %v3001_v28, %v1486_v29  ;;  %v3437_v27 = vld [vmem:[%s5351_s1 + $0x18] sm:$0xff]   ;;  %s5893_s1 = smov %s5890_s25 }
 0x50e   : > { %v1489_v33 = vpop.f32.mrb[2].mxu0 }
 0x50f   : > { %v1631_v34 = vsel %vm1626_vm3, %v1619_v30, 0  ;;  %v3132_v36 = vpop.f32.mrb[3].mxu0  ;;  %v1618_v37 = vpack.c.bf16 %v1487_v35, %v1487_v35 }
 0x510   : > { %3150 = vmatpush3.bf16.xpose.msra.mxu1 %v1631_v34  ;;  %v3039_v34 = vld [vmem:[%s5893_s1 + $0x1] ss:$0 sm:$0xff] }
 0x511   : > { %3161 = vmatprep.subr.bf16.mxu1 %v4348_v17 }
 0x514   : > { %v1612_v52 = vpop.f32.mrb[4].mxu0 }
 0x515   : > { %v3147_v53 = vpop.f32.mrb[5].mxu0  ;;  %v1613_v57 = vadd.f32 %v3009_v55, %v1612_v52 }
 0x516   : > { %v1615_v54 = vpop.f32.mrb[6].mxu0 }
 0x517   : > { %3152 = vmatmul.mubr.msk.bf16.vlgmr.msra.gmra.mrb[4].mxu1 %vm1626_vm3, %v1618_v37  ;;  %v3148_v56 = vpop.f32.mrb[7].mxu0  ;;  %v1686_v58 = vpack.c.bf16 %v1613_v57, %v1613_v57 }
 0x518   : > { %3165 = vmatprep.mubr.msk.bf16.mxu1 %vm4349_vm1, %v4348_v17  ;;  %3162 = vmatpush3.bf16.msra.mxu1 %v3434_v60 }
 0x519   : > { %v1692_v59 = vsel %vm1690_vm5, %v1686_v58, 0  ;;  %3163 = vmatprep.subr.bf16.mxu1 %v4348_v17 }
 0x51a   : > { %3156 = vmatpush3.bf16.msra.mxu0 %v1692_v59 }
 0x51b   : > { %3169 = vmatprep.subr.bf16.mxu0 %v4348_v17 }
 0x51c   : > { %3164 = vmatpush3.bf16.msra.mxu1 %v3435_v61 }
 0x51d   : > { %3177 = vmatprep.subr.bf16.mxu1 %v4348_v17 }
 0x51f   : > { %3166 = vmatmul.mubr.msk.bf16.vlgmr.msra.gmra.mrb[8].mxu1 %vm1448_vm2, %v5474_v22 }
 0x520   : > { %3181 = vmatprep.mubr.msk.bf16.mxu1 %vm4349_vm1, %v4348_v17  ;;  %3178 = vmatpush3.bf16.msra.mxu1 %v3436_v26  ;;  %v3442_v26 = vld [vmem:[%s5412_s5] sm:$0xff]  }
 0x521   : > { %3179 = vmatprep.subr.bf16.mxu1 %v4348_v17 }
 0x524   : > { %3180 = vmatpush3.bf16.msra.mxu1 %v3437_v27  ;;  %v3443_v27 = vld [vmem:[%s5412_s5 + $0x8] sm:$0xff]  }
 0x525   : > { %3191 = vmatprep.subr.bf16.mxu1 %v4348_v17 }
 0x527   : > { %3182 = vmatmul.mubr.msk.bf16.vlgmr.msra.gmra.mrb[12].mxu1 %vm1448_vm2, %v5474_v22 }
 0x528   : > { %3193 = vmatprep.mubr.msk.bf16.mxu1 %vm4349_vm1, %v4348_v17 }
 0x5ea   : > { %v1667_v41 = vpop.f32.mrb[4].mxu1 }
 0x5eb   : > { %v1668_v42 = vadd.f32 %v5506_v40, %v1667_v41  ;;  %v3153_v43 = vpop.f32.mrb[5].mxu1 }
 0x5ec   : > { %v1670_v44 = vpop.f32.mrb[6].mxu1 }
 0x5ed   : > { %v3154_v45 = vpop.f32.mrb[7].mxu1  ;;  %v1674_v46 = vsel %vm1673_vm4, %v1668_v42, -inf }
 0x5ee   : > { %1675 = vmax.xlane.f32.xlu0 %v1674_v46  ;;  %v3439_v46 = vld [vmem:[%s5367_s26 + $0x8] sm:$0xff]  }
 0x5f2   : > { %v1796_v4 = vpop.f32.mrb[8].mxu1 }
 0x5f3   : > { %v3167_v5 = vpop.f32.mrb[9].mxu1  ;;  %v1797_v24 = vadd.f32 %v3021_v18, %v1796_v4  ;;  %v3052_v18 = vld [vmem:[%s1174_s28] ss:$0 sm:$0xff]  ;;  %s5896_s28 = scalar_lea.vmem [#allocation22], %s5310_s24 }
 0x5f4   : > { %v1799_v6 = vpop.f32.mrb[10].mxu1 }
 0x5f5   : > { %v3168_v7 = vpop.f32.mrb[11].mxu1  ;;  %v1932_v25 = vpack.c.bf16 %v1797_v24, %v1797_v24 }
 0x5fa   : > { %v1926_v35 = vpop.f32.mrb[12].mxu1 }
 0x5fb   : > { %v1927_v36 = vadd.f32 %v3039_v34, %v1926_v35  ;;  %v3183_v37 = vpop.f32.mrb[13].mxu1 }
 0x5fc   : > { %v1929_v38 = vpop.f32.mrb[14].mxu1 }
 0x5fd   : > { %v3184_v39 = vpop.f32.mrb[15].mxu1 }
 0x67b   : > { %v1676_v47 = vpop.xlane.xlu0 %1675 }
 0x67c   : > { %v1677_v48 = vsub.f32 %v1668_v42, %v1676_v47 }
 0x67e   : > { %v1678_v49 = vmul.f32 1.442695, %v1677_v48 }
 0x680   : > { %3446 = vpow2.f32 %v1678_v49 }
 0x68a   : > { %v3447_v50 = vpop.eup %3446 }
 0x68b   : > { %v1680_v51 = vsel %vm1673_vm4, %v3447_v50, 0.0 }
 0x68c   : > { %1681 = vadd.xlane.f32.xlu0 %v1680_v51 }
 0x719   : > { %v1682_v62 = vpop.xlane.xlu0 %1681 }
 0x71a   : > { %3448 = vrcp.f32 %v1682_v62 }
 0x724   : > { %v3449_v63 = vpop.eup %3448 }
 0x725   : > { %v1684_v0 = vmul.f32 %v3449_v63, %v3447_v50  ;;  %v3438_v50 = vld [vmem:[%s5367_s26] sm:$0xff]   ;;  %s5894_s26 = scalar_lea.vmem [#allocation18], %s5310_s24 }
 0x726   : > { %v3051_v63 = vld [vmem:[%s5894_s26] ss:$0 sm:$0xff] }
 0x727   : > { %v1685_v2 = vpack.c.bf16 %v1684_v0, %v1684_v0 }
 0x729   : > { %3158 = vmatmul.mubr.msk.bf16.vlgmr.msra.gmra.mrb[8].mxu0 %vm1673_vm4, %v1685_v2 }
 0x72a   : > { %3170 = vmatpush3.bf16.msra.mxu0 %v3432_v1  ;;  %3173 = vmatprep.mubr.msk.bf16.mxu0 %vm4349_vm1, %v4348_v17 }
 0x72b   : > { %3171 = vmatprep.subr.bf16.mxu0 %v4348_v17 }
 0x72e   : > { %3172 = vmatpush3.bf16.msra.mxu0 %v3433_v3 }
 0x72f   : > { %3185 = vmatprep.subr.bf16.mxu0 %v4348_v17 }
 0x731   : > { %3174 = vmatmul.mubr.msk.bf16.vlgmr.msra.gmra.mrb[12].mxu0 %vm1448_vm2, %v5474_v22  ;;  %v1992_v22 = vpack.c.bf16 %v1927_v36, %v1927_v36 }
 0x732   : > { %3187 = vmatprep.mubr.msk.bf16.mxu0 %vm4349_vm1, %v4348_v17 }
 0x733   : > { %v1997_v41 = vsel %vm1690_vm5, %v1992_v22, 0 }
 0x734   : > { %3192 = vmatpush3.bf16.msra.mxu1 %v1997_v41 }
 0x735   : > { %3203 = vmatprep.subr.bf16.mxu1 %v4348_v17 }
 0x7fc   : > { %v5534_v8 = vpop.f32.mrb[8].mxu0 }
 0x7fd   : > { %v3159_v9 = vpop.f32.mrb[9].mxu0  ;;  %v1734_v52 = vpack.c.bf16 %v5534_v8, %v5534_v8 }
 0x7fe   : > { %v1731_v10 = vpop.f32.mrb[10].mxu0 }
 0x7ff   : > { %v3160_v11 = vpop.f32.mrb[11].mxu0 }
 0x804   : > { %v1861_v13 = vpop.f32.mrb[12].mxu0 }
 0x805   : > { %v1862_v14 = vadd.f32 %v3030_v12, %v1861_v13  ;;  %v3175_v15 = vpop.f32.mrb[13].mxu0  ;;  %v3440_v12 = vld [vmem:[%s5396_s4] sm:$0xff]   ;;  %v3441_v13 = vld [vmem:[%s5396_s4 + $0x8] sm:$0xff]   ;;  %s5897_s4 = scalar_lea.vmem [#allocation24], %s5310_s24 }
 0x806   : > { %v1864_v16 = vpop.f32.mrb[14].mxu0 }
 0x807   : > { %v1933_v19 = vpack.c.bf16 %v1862_v14, %v1862_v14  ;;  %v3176_v21 = vpop.f32.mrb[15].mxu0 }
 0x808   : > { %v3053_v21 = vld [vmem:[%s5895_s3] ss:$0 sm:$0xff] }
 0x809   : > { %v1938_v23 = vsel %vm1626_vm3, %v1933_v19, 0 }
 0x80a   : > { %3186 = vmatpush3.bf16.xpose.msra.mxu0 %v1938_v23 }
 0x80b   : > { %3197 = vmatprep.subr.bf16.mxu0 %v4348_v17 }
 0x811   : > { %3188 = vmatmul.mubr.msk.bf16.vlgmr.msra.gmra.mrb[16].mxu0 %vm1626_vm3, %v1932_v25 }
 0x812   : > { %3199 = vmatprep.mubr.msk.bf16.mxu0 %vm4349_vm1, %v4348_v17  ;;  %3198 = vmatpush3.bf16.msra.mxu0 %v3439_v46 }
 0x813   : > { %3209 = vmatprep.subr.bf16.mxu0 %v4348_v17 }
 0x8e4   : > { %v1974_v28 = vpop.f32.mrb[16].mxu0 }
 0x8e5   : > { %v1975_v29 = vadd.f32 %v5506_v40, %v1974_v28  ;;  %v3189_v30 = vpop.f32.mrb[17].mxu0  ;;  %v3444_v28 = vld [vmem:[%s5412_s5 + $0x10] sm:$0xff]  }
 0x8e6   : > { %v1977_v31 = vpop.f32.mrb[18].mxu0  ;;  %v3054_v30 = vld [vmem:[%s5896_s28] ss:$0 sm:$0xff] }
 0x8e7   : > { %v3190_v32 = vpop.f32.mrb[19].mxu0  ;;  %v1980_v33 = vsel %vm1673_vm4, %v1975_v29, -inf }
 0x8e8   : > { %1981 = vmax.xlane.f32.xlu1 %v1980_v33 }
 0x975   : > { %v1982_v40 = vpop.xlane.xlu1 %1981 }
 0x976   : > { %v1983_v42 = vsub.f32 %v1975_v29, %v1982_v40  ;;  %v3445_v29 = vld [vmem:[%s5412_s5 + $0x18] sm:$0xff]   ;;  %s5899_s5 = sld [smem:[#allocation62_spill]] }
 0x978   : > { %v1984_v43 = vmul.f32 1.442695, %v1983_v42 }
 0x97a   : > { %3450 = vpow2.f32 %v1984_v43 }
 0x97c   : > { %p3066_p10 = scmp.ne.s32.totalorder %s5899_s5, 1 }
 0x97d   : > { %vm4351_vm7 = vmmov (!%p3066_p10), 0   ;;  %vm2438_vm8 = vcmask (!%p3066_p10), 253952  }
 0x984   : > { %v3451_v44 = vpop.eup %3450 }
 0x985   : > { %v1986_v45 = vsel %vm1673_vm4, %v3451_v44, 0.0 }
 0x986   : > { %1987 = vadd.xlane.f32.xlu1 %v1986_v45 }
 0xa13   : > { %v1988_v47 = vpop.xlane.xlu1 %1987 }
 0xa14   : > { %3452 = vrcp.f32 %v1988_v47 }
 0xa1e   : > { %v3453_v48 = vpop.eup %3452 }
 0xa1f   : > { %v1990_v49 = vmul.f32 %v3453_v48, %v3451_v44  ;;  %v3058_v44 = vld [vmem:[%s5897_s4] ss:$0 sm:$0xff] }
 0xa21   : > { %v1991_v51 = vpack.c.bf16 %v1990_v49, %v1990_v49 }
 0xa23   : > { %3194 = vmatmul.mubr.msk.bf16.vlgmr.msra.gmra.mrb[16].mxu1 %vm1673_vm4, %v1991_v51 }
 0xa24   : > { %3204 = vmatpush3.bf16.msra.mxu1 %v3438_v50  ;;  %3205 = vmatprep.mubr.msk.bf16.mxu1 %vm4349_vm1, %v4348_v17 }
 0xa25   : > { %3217 = vmatprep.subr.bf16.mxu1 %v4348_v17 }
 0xa2b   : > { %3206 = vmatmul.mubr.msk.bf16.vlgmr.msra.gmra.mrb[20].mxu1 %vm1626_vm3, %v1734_v52 }
 0xa2c   : > { %3225 = vmatprep.mubr.msk.bf16.mxu1 %vm4349_vm1, %v4348_v17  ;;  %3218 = vmatpush3.bf16.msra.mxu1 %v3442_v26 }
 0xa2d   : > { %3219 = vmatprep.subr.bf16.mxu1 %v4348_v17 }
 0xa30   : > { %3220 = vmatpush3.bf16.msra.mxu1 %v3443_v27 }
 0xa31   : > { %3221 = vmatprep.subr.bf16.mxu1 %v4348_v17 }
 0xa34   : > { %3222 = vmatpush3.bf16.msra.mxu1 %v3444_v28 }
 0xa35   : > { %3223 = vmatprep.subr.bf16.mxu1 %v4348_v17 }
 0xa38   : > { %3224 = vmatpush3.bf16.msra.mxu1 %v3445_v29 }
 0xaf6   : > { %v2033_v53 = vpop.f32.mrb[16].mxu1 }
 0xaf7   : > { %v2039_v54 = vpack.c.bf16 %v2033_v53, %v2033_v53  ;;  %v3195_v55 = vpop.f32.mrb[17].mxu1 }
 0xaf8   : > { %v2036_v56 = vpop.f32.mrb[18].mxu1 }
 0xaf9   : > { %v3196_v57 = vpop.f32.mrb[19].mxu1  ;;  %3200 = vmatmul.mubr.msk.bf16.vlgmr.msra.gmra.mrb[20].mxu0 %vm1626_vm3, %v2039_v54 }
 0xafa   : > { %3213 = vmatprep.mubr.msk.bf16.mxu0 %vm4349_vm1, %v4348_v17  ;;  %3210 = vmatpush3.bf16.msra.mxu0 %v3440_v12 }
 0xafb   : > { %3211 = vmatprep.subr.bf16.mxu0 %v4348_v17 }
 0xafe   : > { %v2135_v58 = vpop.f32.mrb[20].mxu1  ;;  %3212 = vmatpush3.bf16.msra.mxu0 %v3441_v13 }
 0xaff   : > { %v3207_v59 = vpop.f32.mrb[21].mxu1 }
 0xb00   : > { %v2138_v60 = vpop.f32.mrb[22].mxu1 }
 0xb01   : > { %v3208_v61 = vpop.f32.mrb[23].mxu1 }
 0xb02   : > { %v3064_v61 = vld [vmem:[%s1224_s29] ss:$0 sm:$0xff] }
 0xbcc   : > { %v2086_v62 = vpop.f32.mrb[20].mxu0 }
 0xbcd   : > { %v2136_v0 = vadd.f32 %v2135_v58, %v2086_v62  ;;  %v3201_v1 = vpop.f32.mrb[21].mxu0 }
 0xbce   : > { %v2089_v2 = vpop.f32.mrb[22].mxu0 }
 0xbcf   : > { %v2148_v3 = vadd.f32 %v3051_v63, %v2136_v0  ;;  %v3202_v4 = vpop.f32.mrb[23].mxu0  ;;  %v3065_v63 = vld [vmem:[%s5898_s7] ss:$0 sm:$0xff]  ;;  %v3460_v2 = vld [vmem:[#allocation27] sm:$0xff] (!%p3066_p10)  }
 0xbd0   : > { %v3461_v4 = vld [vmem:[#allocation27 + $0x8] sm:$0xff] (!%p3066_p10)  }
 0xbd1   : > { %v2149_v5 = vadd.f32 %v2148_v3, %v5467_v20  ;;  %v4350_v3 = vmov (!%p3066_p10), 0.0  }
 0xbd2   : > { %3229 = vmatprep.subr.bf16.mxu0 (!%p3066_p10), %v4350_v3 }
 0xbd3   : > { %v2152_v6 = vsel %vm1448_vm2, %v2149_v5, 0.0 }
 0xbd4   : > { %2153 = vadd.xlane.f32.xlu0 %v2152_v6  ;;  %v2381_v6 = vld [vmem:[#allocation28] sm:$0x1] (!%p3066_p10) }
 0xc61   : > { %v2154_v7 = vpop.xlane.xlu0 %2153 }
 0xc62   : > { %v2156_v8 = vmul.f32 0.03125, %v2154_v7 }
 0xc64   : > { %v2157_v9 = vsub.f32 %v2149_v5, %v2156_v8 }
 0xc66   : > { %v2158_v10 = vmul.f32 %v2157_v9, %v2157_v9 }
 0xc68   : > { %v2159_v11 = vsel %vm1448_vm2, %v2158_v10, 0.0 }
 0xc69   : > { %2160 = vadd.xlane.f32.xlu1 %v2159_v11 }
 0xcf6   : > { %v2161_v20 = vpop.xlane.xlu1 %2160 }
 0xcf7   : > { %v2162_v14 = vmul.f32 0.03125, %v2161_v20 }
 0xcf9   : > { %v2163_v15 = vadd.f32 1e-12, %v2162_v14 }
 0xcfb   : > { %3454 = vrsqrt.f32 %v2163_v15 }
 0xd05   : > { %v3455_v16 = vpop.eup %3454 }
 0xd06   : > { %v2165_v19 = vmul.f32 %v3455_v16, %v2157_v9 }
 0xd08   : > { %v2172_v23 = vmul.f32 %v3052_v18, %v2165_v19 }
 0xd0a   : > { %v2179_v24 = vadd.f32 %v3053_v21, %v2172_v23 }
 0xd0c   : > { %v2180_v25 = vpack.c.bf16 %v2179_v24, %v2179_v24 }
 0xd0e   : > { %3214 = vmatmul.mubr.msk.bf16.vlgmr.msra.gmra.mrb[24].mxu0 %vm1448_vm2, %v2180_v25 }
 0xd0f   : > { %3230 = vmatpush3.bf16.msra.mxu0 (!%p3066_p10), %v3460_v2  ;;  %3233 = vmatprep.mubr.msk.bf16.mxu0 (!%p3066_p10), %vm4351_vm7, %v4350_v3 }
 0xd10   : > { %3231 = vmatprep.subr.bf16.mxu0 (!%p3066_p10), %v4350_v3 }
 0xd13   : > { %3232 = vmatpush3.bf16.msra.mxu0 (!%p3066_p10), %v3461_v4 }
 0xde1   : > { %v2241_v31 = vpop.f32.mrb[24].mxu0 }
 0xde2   : > { %v2242_v32 = vadd.f32 %v3054_v30, %v2241_v31  ;;  %v3215_v33 = vpop.f32.mrb[25].mxu0 }
 0xde3   : > { %v2244_v34 = vpop.f32.mrb[26].mxu0 }
 0xde4   : > { %v2248_v35 = vmul.f32 0.044715, %v2242_v32  ;;  %v3216_v36 = vpop.f32.mrb[27].mxu0  ;;  %v2247_v40 = vmul.f32 0.5, %v2242_v32 }
 0xde6   : > { %v2249_v37 = vmul.f32 %v2248_v35, %v2242_v32 }
 0xde8   : > { %v2250_v38 = vmul.f32 %v2249_v37, %v2242_v32 }
 0xdea   : > { %v2251_v22 = vadd.f32 %v2250_v38, %v2242_v32 }
 0xdec   : > { %v2252_v39 = vmul.f32 0.7978846, %v2251_v22 }
 0xdee   : > { %3456 = vtanh.f32 %v2252_v39 }
 0xdf8   : > { %v3457_v41 = vpop.eup %3456 }
 0xdf9   : > { %v2254_v42 = vadd.f32 1.0, %v3457_v41 }
 0xdfb   : > { %v2255_v43 = vmul.f32 %v2254_v42, %v2247_v40 }
 0xdfd   : > { %v2256_v17 = vpack.c.bf16 %v2255_v43, %v2255_v43 }
 0xdff   : > { %3226 = vmatmul.mubr.msk.bf16.vlgmr.msra.gmra.mrb[24].mxu1 %vm2296_vm6, %v2256_v17 }
 0xed2   : > { %v2334_v45 = vpop.f32.mrb[24].mxu1 }
 0xed3   : > { %v2335_v46 = vadd.f32 %v3058_v44, %v2334_v45  ;;  %v3227_v47 = vpop.f32.mrb[25].mxu1 }
 0xed4   : > { %v2337_v48 = vpop.f32.mrb[26].mxu1 }
 0xed5   : > { %v3228_v49 = vpop.f32.mrb[27].mxu1  ;;  %v2340_v50 = vadd.f32 %v2335_v46, %v2179_v24 }
 0xed7   : > { %v2343_v51 = vsel %vm1448_vm2, %v2340_v50, 0.0 }
 0xed8   : > { %2344 = vadd.xlane.f32.xlu0 %v2343_v51 }
 0xf65   : > { %v2345_v52 = vpop.xlane.xlu0 %2344 }
 0xf66   : > { %v2346_v53 = vmul.f32 0.03125, %v2345_v52 }
 0xf68   : > { %v2347_v54 = vsub.f32 %v2340_v50, %v2346_v53 }
 0xf6a   : > { %v2348_v55 = vmul.f32 %v2347_v54, %v2347_v54 }
 0xf6c   : > { %v2349_v56 = vsel %vm1448_vm2, %v2348_v55, 0.0 }
 0xf6d   : > { %2350 = vadd.xlane.f32.xlu1 %v2349_v56 }
 0xffa   : > { %v2351_v57 = vpop.xlane.xlu1 %2350 }
 0xffb   : > { %v2352_v58 = vmul.f32 0.03125, %v2351_v57 }
 0xffd   : > { %v2353_v59 = vadd.f32 1e-12, %v2352_v58 }
 0xfff   : > { %3458 = vrsqrt.f32 %v2353_v59 }
0x1009   : > { %v3459_v60 = vpop.eup %3458 }
0x100a   : > { %v2355_v62 = vmul.f32 %v3459_v60, %v2347_v54  ;;  %2374 = sbr.rel (%p3066_p10) target bundleno = 4340 (0x10f4), region = 204 }
0x100c   : > { %v2362_v0 = vmul.f32 %v3064_v61, %v2355_v62 }
0x100e   : > { %v2369_v1 = vadd.f32 %v3065_v63, %v2362_v0 }
0x1010   : > { %2370 = vst.msk [vmem:[#allocation2] sm:$0xff] %vm1448_vm2, %v2369_v1  ;;  %2375 = vst.msk [vmem:[%s5451_s17] sm:$0xff] (!%p3066_p10), %vm1448_vm2, %v2369_v1  ;;  %v2376_v5 = vpack.c.bf16 (!%p3066_p10), %v2369_v1, %v2369_v1 }
0x1012   : > { %3234 = vmatmul.mubr.msk.bf16.vlgmr.msra.gmra.mrb[0].mxu0 %vm1448_vm2, %v2376_v5 }
0x10e5   : > { %v2431_v7 = vpop.f32.mrb[0].mxu0 }
0x10e6   : > { %v2432_v8 = vadd.f32 %v2431_v7, %v2381_v6  ;;  %v3235_v9 = vpop.f32.mrb[1].mxu0 }
0x10e7   : > { %v2434_v10 = vpop.f32.mrb[2].mxu0 }
0x10e8   : > { %3462 = vtanh.f32 %v2432_v8  ;;  %v3236_v11 = vpop.f32.mrb[3].mxu0 }
0x10f2   : > { %v3463_v12 = vpop.eup %3462 }
0x10f3   : > { %2439 = vst.msk [vmem:[%s1383_s23] sm:$0x1] %vm2438_vm8, %v3463_v12 }
0x10f4 PF: > { %s5900_s24 = sld [smem:[#allocation63_spill]]  ;;  %s5901_s29 = sld [smem:[#allocation73_spill]] }
0x10f5   : > { %s5902_s25 = sld [smem:[#allocation94_spill]]  ;;  %s2458_s1 = sshll.u32 %s5451_s17, 4  ;;  %s2459_s1 = int_to_ptr.vmem [resolvable:$true] %s2458_s1 }
0x10f6   : > { %s2441_s26 = scalar_lea.sflag [#allocation5], %s5277_s27  ;;  %s4080_s3 = scalar_lea.vmem %s2459_s1, 128 }
0x10f7   : > { %p4081_p1 = scmp.ne.s32.totalorder %s2459_s1, %s4080_s3  ;;  %s4352_s28 = smov [#allocation30]  }
0x10f8   : > { %s4084_s4 = sshll.u32 %s4352_s28, 4  ;;  %s4085_s4 = int_to_ptr.vmem [resolvable:$false] %s4084_s4 }
0x10f9   : > { %s4086_s7 = scalar_lea.vmem %s4085_s4, 256  ;;  %p4087_p13 = scmp.lt.s32.totalorder %s2459_s1, %s4085_s4 }
0x10fa   : > { %s3071_s30 = sshll.u32 %s5900_s24, 7  ;;  %p5904_p7 = scmp.ne.s32.totalorder %s5901_s29, 0 }
0x10fb   : > { %s5903_s13 = smov %s5902_s25  ;;  %s5616_s2 = scalar_lea.hbm %s5902_s25, %s3071_s30 }
0x10fc   : > { %p4082_p2 = pnand %p4081_p1, %p5904_p7  ;;  %p4088_p5 = scmp.lt.s32.totalorder %s4086_s7, %s4080_s3 }
0x10fe   : > { %p4083_p3 = pneg %p4082_p2  ;;  %p4089_p12 = por %p4088_p5, %p4087_p13 }
0x1100   : > { %p4090_p4 = pnand %p4089_p12, %p4083_p3 }
0x1102   : > { %4093 = shalt.err (!%p4090_p4)
}
0x1103   : > { %s4094_s17 = scalar_lea.hbm %s5616_s2, 128  ;;  %s4098_s22 = scalar_lea.hbm %s5903_s13, 256 }
0x1104   : > { %p4095_p0 = scmp.ne.s32.totalorder %s5616_s2, %s4094_s17  ;;  %p4099_p9 = scmp.lt.u32.totalorder %s5616_s2, %s5903_s13 }
0x1105   : > { %p4100_p8 = scmp.lt.u32.totalorder %s4098_s22, %s4094_s17  ;;  %p4102_p1 = scmp.lt.u32.totalorder %s4094_s17, %s5616_s2 }
0x1106   : > { %p4096_p11 = pnand %p4095_p0, %p5904_p7 }
0x1107   : > { %p4101_p10 = por %p4100_p8, %p4099_p9 }
0x1108   : > { %p4097_p6 = pneg %p4096_p11 }
0x1109   : > { %p4103_p2 = por %p4102_p1, %p4101_p10 }
0x110b   : > { %p4104_p3 = pnand %p4103_p2, %p4097_p6 }
0x110d   : > { %4107 = shalt.err (!%p4104_p3)
}
0x110e   : > { %3289 = dma.vmem_to_hbm [thread:$0]  (%p5904_p7), %s2459_s1, 128, %s5616_s2, %s2441_s26  }
0x110f   : > { %s3072_s3 = sshll.u32 %s5900_s24, 4  ;;  %s2471_s28 = sshll.u32 %s1383_s23, 4  ;;  %s2472_s28 = int_to_ptr.vmem [resolvable:$true] %s2471_s28 }
0x1110   : > { %s5905_s5 = sld [smem:[#allocation95_spill]]  ;;  %s2446_s17 = scalar_lea.sflag [#allocation32], %s5277_s27 }
0x1111   : > { %s4108_s22 = scalar_lea.vmem %s2472_s28, 16  ;;  %s4353_s25 = smov [#allocation31]  }
0x1112   : > { %p4109_p13 = scmp.ne.s32.totalorder %s2472_s28, %s4108_s22  ;;  %s4112_s0 = sshll.u32 %s4353_s25, 4  ;;  %s4113_s0 = int_to_ptr.vmem [resolvable:$false] %s4112_s0 }
0x1113   : > { %s4114_s8 = scalar_lea.vmem %s4113_s0, 32  ;;  %p4115_p4 = scmp.lt.s32.totalorder %s2472_s28, %s4113_s0 }
0x1114   : > { %p4110_p5 = pnand %p4109_p13, %p5904_p7  ;;  %p4116_p0 = scmp.lt.s32.totalorder %s4114_s8, %s4108_s22 }
0x1116   : > { %s5906_s16 = smov %s5905_s5  ;;  %s5643_s30 = scalar_lea.hbm %s5905_s5, %s3072_s3 }
0x1117   : > { %p4111_p12 = pneg %p4110_p5  ;;  %p4117_p11 = por %p4116_p0, %p4115_p4 }
0x1119   : > { %p4118_p6 = pnand %p4117_p11, %p4111_p12 }
0x111b   : > { %4121 = shalt.err (!%p4118_p6)
}
0x111c   : > { %s4122_s27 = scalar_lea.hbm %s5643_s30, 16  ;;  %s4126_s2 = scalar_lea.hbm %s5906_s16, 32 }
0x111d   : > { %p4123_p9 = scmp.ne.s32.totalorder %s5643_s30, %s4122_s27  ;;  %p4127_p1 = scmp.lt.u32.totalorder %s5643_s30, %s5906_s16 }
0x111e   : > { %p4128_p2 = scmp.lt.u32.totalorder %s4126_s2, %s4122_s27  ;;  %p4130_p13 = scmp.lt.u32.totalorder %s4122_s27, %s5643_s30 }
0x111f   : > { %p4124_p8 = pnand %p4123_p9, %p5904_p7 }
0x1120   : > { %p4129_p3 = por %p4128_p2, %p4127_p1 }
0x1121   : > { %p4125_p10 = pneg %p4124_p8 }
0x1122   : > { %p4131_p5 = por %p4130_p13, %p4129_p3 }
0x1124   : > { %p4132_p12 = pnand %p4131_p5, %p4125_p10 }
0x1126   : > { %4135 = shalt.err (!%p4132_p12)
}
0x1127   : > { %3290 = dma.vmem_to_hbm [thread:$0]  (%p5904_p7), %s2472_s28, 16, %s5643_s30, %s2446_s17  }
0x1128 PF: > { %s5907_s8 = sld [smem:[#allocation65_spill]]  ;;  %s5908_s26 = sld [smem:[#allocation59_spill]] }
0x1129   : > { %s5909_s3 = sld [smem:[#allocation74_spill]] }
0x112e   : > { %p3321_p4 = scmp.ge.s32.totalorder %s5907_s8, 2  ;;  %s2483_s4 = sand.u32 1, %s5908_s26  }
0x112f   : > { %p5910_p0 = scmp.ne.s32.totalorder %s5909_s3, 0  ;;  %s2484_s7 = scalar_lea.sflag [#allocation5], %s2483_s4 }
0x1131   : > { %p3307_p11 = pnand %p3321_p4, %p5910_p0 }
0x1133   : > { %4269 = dma.done.wait (!%p3307_p11), %s2484_s7, 128  }
0x1134   : > { %4271 = vsyncadd (!%p3307_p11), %s2484_s7, 4294967168  ;;  %s2493_s5 = scalar_lea.sflag [#allocation32], %s2483_s4 }
0x1135   : > { %4273 = dma.done.wait (!%p3307_p11), %s2493_s5, 16  }
0x1136   : > { %4275 = vsyncadd (!%p3307_p11), %s2493_s5, 4294967280  ;;  %s48_s7 = sadd.s32 1, %s5907_s8   ;;  %s5911_s4 = sld [smem:[#allocation57_spill]] }
0x1137   : > { %p45_p6 = scmp.ge.s32.totalorder %s48_s7, 6   ;;  %s5912_s30 = sld [smem:[#allocation58_spill]] }
0x1138   : > { %s5913_s24 = sld [smem:[#allocation70_spill]]  ;;  %s5914_s25 = sld [smem:[#allocation60_spill]] }
0x1139   : > { %s5915_s5 = sld [smem:[#allocation61_spill]]  ;;  %s5916_s1 = sld [smem:[#allocation71_spill]] }
0x113a   : > { %s5917_s2 = sld [smem:[#allocation64_spill]]  ;;  %s5918_s29 = sld [smem:[#allocation67_spill]] }
0x113b   : > { %s5919_s27 = sld [smem:[#allocation68_spill]]  ;;  %s5920_s26 = smov %s4310_s6 }
0x113c   :  { %47 = sbr.rel (!%p45_p6) target bundleno = 36 (0x24), region = 390 }
0x1140   : > { %s5921_s6 = smov %s5918_s29 }
0x1143   :  { %2497 = vsyncpa [#allocation4], 1 }
0x1144   :  { %2499 = vsyncpa [#allocation4 + $0x1], 1 }
0x1145   :  { %2500 = vsyncpa [#allocation7], 1 }
0x1146   :  { %2502 = vsyncpa [#allocation7 + $0x1], 1 }
0x1147   :  { %2503 = vsyncpa [#allocation10], 1 }
0x1148   :  { %2504 = vsyncpa [#allocation29], 1 }
0x1149   :  { %2505 = vsyncpa [#allocation5], 1 }
0x114a   :  { %2507 = vsyncpa [#allocation5 + $0x1], 1 }
0x114b   :  { %2508 = vsyncpa [#allocation32], 1 }
0x114c   :  { %2510 = vsyncpa [#allocation32 + $0x1], 1 }

</bundles_post_ra>
